<compile_context>
chip_gen: v5e
topology: v5e:2x2
jax: 0.10.0
libtpu: 0.0.40
codegen_flags: <defaults>
</compile_context>

<pallas_src>
import jax
import jax.numpy as jnp
from jax.experimental import pallas as pl
from jax.experimental.pallas import tpu as pltpu


def _sae_kernel(x_ref, w_enc_ref, b_enc_ref, w_dec_ref, b_dec_ref,
                recon_ref, hidden_ref, sq_part_ref, abs_part_ref,
                x_lo_ref):
    """Grid: (batch_tile index i [parallel], hidden_tile index h [arbitrary])."""
    h = pl.program_id(1)
    nh = pl.num_programs(1)
    bt = x_ref.shape[0]

    # Once per batch tile: cast x to the MXU operand dtype (hoisted out of the
    # H sweep) and reset the |hidden| partial accumulator (resident output).
    @pl.when(h == 0)
    def _():
        x_lo_ref[...] = x_ref[...].astype(x_lo_ref.dtype)
        abs_part_ref[...] = jnp.zeros_like(abs_part_ref)

    # Encoder: hidden_tile = relu(x @ W_enc_tile + b_enc_tile)
    # low-precision MXU operands, f32 accumulation; elementwise math in f32.
    pre = jnp.dot(x_lo_ref[...], w_enc_ref[...],
                  preferred_element_type=jnp.float32)
    pre = pre + b_enc_ref[...].astype(jnp.float32)          # (bt, ht) + (1, ht)
    hidden = jnp.maximum(pre, 0.0)                          # f32, >= 0
    hidden_ref[...] = hidden.astype(hidden_ref.dtype)

    ht = hidden.shape[1]
    # |hidden| == hidden after ReLU.  Reduce only the row-block axis (pure
    # vreg adds, VPU); the cross-lane finish happens in the JAX epilogue.
    abs_part_ref[...] += jnp.sum(
        hidden.reshape(bt // 8, 8, ht), axis=0).reshape(abs_part_ref.shape)

    # Decoder partial product, accumulated over H tiles directly in the f32
    # reconstruction output block (resident across the h axis).
    dec = jnp.dot(hidden.astype(w_dec_ref.dtype), w_dec_ref[...],
                  preferred_element_type=jnp.float32)

    @pl.when(h == 0)
    def _():
        recon_ref[...] = dec

    @pl.when(h > 0)
    def _():
        recon_ref[...] += dec

    # Finalize this batch tile on the last H tile.
    @pl.when(h == nh - 1)
    def _():
        recon = recon_ref[...] + b_dec_ref[...].astype(jnp.float32)  # (bt, D)
        recon_ref[...] = recon
        diff = recon - x_ref[...].astype(jnp.float32)
        d = diff.shape[1]
        sq_part_ref[...] = jnp.sum(
            (diff * diff).reshape(bt // 8, 8, d), axis=0
        ).reshape(sq_part_ref.shape)


def _vmem_capacity_bytes():
    try:
        info = pltpu.get_tpu_info()
        cap = int(getattr(info, "vmem_capacity_bytes", 0))
        if cap > 0:
            return cap
    except Exception:
        pass
    return 64 << 20   # conservative fallback (v7x per-TC VMEM)


def _vmem_estimate(bt, ht, D, xb, wb, hid_b):
    """Rough per-call VMEM footprint (double-buffered pipeline tiles + scratch)."""
    return (2 * bt * D * xb          # x tiles
            + 2 * D * ht * wb        # W_enc tiles
            + 2 * ht * 4             # b_enc tiles
            + 2 * ht * D * wb        # W_dec tiles
            + 2 * D * 4              # b_dec tiles
            + 2 * bt * D * 4         # recon (f32 accumulator) tiles
            + 2 * bt * ht * hid_b    # hidden tiles
            + 2 * 8 * D * 4          # squared-error partial tiles
            + 2 * 8 * ht * 4         # |hidden| partial tiles
            + bt * D * wb)           # low-precision x scratch


def _pick_tiles(B, D, H, xb, wb, hid_b, budget):
    bt_cands = sorted({c for c in (B, 1024, 768, 512, 384, 256, 192, 128, 96, 64, 32, 16, 8)
                       if 0 < c <= B and B % c == 0 and c % 8 == 0}, reverse=True)
    ht_cands = sorted({c for c in (H, 8192, 4096, 2048, 1024, 512, 256, 128)
                       if 0 < c <= H and H % c == 0 and c % 128 == 0}, reverse=True)
    best = None
    for ht in ht_cands:
        for bt in bt_cands:
            if _vmem_estimate(bt, ht, D, xb, wb, hid_b) > budget:
                continue
            # Weight HBM traffic: streamed once if resident (ht == H), else
            # re-streamed once per batch tile.
            wtraffic = 2 * D * H * wb * (1 if ht == H else B // bt)
            key = (wtraffic, -bt, -ht)
            if best is None or key < best[0]:
                best = (key, bt, ht)
    if best is None:
        return bt_cands[-1], ht_cands[-1]
    return best[1], best[2]


def sae_forward(x, w_enc_io, b_enc, w_dec_io, b_dec, sparsity_coeff=0.001,
                batch_tile=None, h_tile=None, hidden_dtype=jnp.bfloat16):
    """SAE forward.

    x        : [B, D] float32
    w_enc_io : [D, H]   encoder weight in [in, out] layout (f32 or bf16)
    b_enc    : [H]
    w_dec_io : [H, D]   decoder weight in [in, out] layout (f32 or bf16)
    b_dec    : [D]
    Returns (reconstruction [B, D] f32, hidden [B, H] hidden_dtype, total_loss f32 scalar).
    """
    B, D = x.shape
    Din, H = w_enc_io.shape
    assert Din == D and w_dec_io.shape == (H, D)
    assert b_enc.shape == (H,) and b_dec.shape == (D,)
    assert x.dtype == jnp.float32, (
        "kernel accumulates the decoder product in the f32 reconstruction output")
    assert D % 128 == 0 and H % 128 == 0 and B % 8 == 0

    xb = jnp.dtype(x.dtype).itemsize
    wb = jnp.dtype(w_enc_io.dtype).itemsize
    hid_b = jnp.dtype(hidden_dtype).itemsize

    cap = _vmem_capacity_bytes()
    pick_budget = int(cap * 0.70)    # tile-selection budget (headroom)
    hard_budget = int(cap * 0.90)    # hard limit for explicit user tiles

    if batch_tile is None or h_tile is None:
        bt_auto, ht_auto = _pick_tiles(B, D, H, xb, wb, hid_b, pick_budget)
        batch_tile = bt_auto if batch_tile is None else batch_tile
        h_tile = ht_auto if h_tile is None else h_tile

    assert B % batch_tile == 0 and batch_tile % 8 == 0
    assert H % h_tile == 0 and h_tile % 128 == 0

    nb = B // batch_tile
    nh = H // h_tile

    est = _vmem_estimate(batch_tile, h_tile, D, xb, wb, hid_b)
    assert est <= hard_budget, (
        f"tile sizes ({batch_tile},{h_tile}) need ~{est >> 20} MiB VMEM, "
        f"budget is {hard_budget >> 20} MiB on this generation; shrink tiles")
    vmem_limit = int(min(cap, max(est + (8 << 20), 32 << 20)))

    b_enc_2d = b_enc.reshape(1, H).astype(jnp.float32)
    b_dec_2d = b_dec.reshape(1, D).astype(jnp.float32)

    weight_stream_factor = 1 if h_tile == H else nb
    cost = pl.CostEstimate(
        flops=4 * B * D * H,                       # two matmuls
        transcendentals=0,
        bytes_accessed=(B * D * xb                 # x read
                        + B * D * 4                # recon write
                        + B * H * hid_b            # hidden write
                        + 2 * D * H * wb * weight_stream_factor
                        + (D + H) * 4
                        + nb * 8 * (D + h_tile) * 4),
    )

    recon, hidden, sq_part, abs_part = pl.pallas_call(
        _sae_kernel,
        out_shape=(
            jax.ShapeDtypeStruct((B, D), x.dtype),              # reconstruction (f32)
            jax.ShapeDtypeStruct((B, H), hidden_dtype),         # hidden
            jax.ShapeDtypeStruct((nb, 8, D), jnp.float32),      # per-tile sum((recon-x)^2) partials
            jax.ShapeDtypeStruct((nb, 8, h_tile), jnp.float32), # per-tile sum(hidden) partials
        ),
        grid_spec=pltpu.PrefetchScalarGridSpec(
            num_scalar_prefetch=0,
            grid=(nb, nh),
            in_specs=[
                pl.BlockSpec((batch_tile, D), lambda i, h: (i, 0)),  # x (resident over h)
                pl.BlockSpec((D, h_tile), lambda i, h: (0, h)),      # W_enc [in,out] tile
                pl.BlockSpec((1, h_tile), lambda i, h: (0, h)),      # b_enc tile
                pl.BlockSpec((h_tile, D), lambda i, h: (h, 0)),      # W_dec [in,out] tile
                pl.BlockSpec((1, D), lambda i, h: (0, 0)),           # b_dec
            ],
            out_specs=[
                pl.BlockSpec((batch_tile, D), lambda i, h: (i, 0)),      # recon / f32 acc
                pl.BlockSpec((batch_tile, h_tile), lambda i, h: (i, h)), # hidden
                pl.BlockSpec((1, 8, D), lambda i, h: (i, 0, 0)),         # sq partials
                pl.BlockSpec((1, 8, h_tile), lambda i, h: (i, 0, 0)),    # |hidden| partials
            ],
            scratch_shapes=[
                pltpu.VMEM((batch_tile, D), w_enc_io.dtype),   # x cast once per batch tile
            ],
        ),
        compiler_params=pltpu.CompilerParams(
            dimension_semantics=("parallel", "arbitrary"),   # batch parallel, H-reduction serial
            vmem_limit_bytes=vmem_limit,
        ),
        cost_estimate=cost,
    )(x, w_enc_io, b_enc_2d, w_dec_io, b_dec_2d)

    # Tiny epilogue in plain JAX (finishes the cross-lane reductions and keeps
    # the batch grid axis race-free / parallel).
    sq_sum = jnp.sum(sq_part, dtype=jnp.float32)
    abs_sum = jnp.sum(abs_part, dtype=jnp.float32)
    recon_loss = sq_sum / jnp.float32(B * D)
    sparsity_loss = jnp.float32(sparsity_coeff) * abs_sum / jnp.float32(B * H)
    return recon, hidden, recon_loss + sparsity_loss


def init_sae_params(key, input_dim, hidden_dim):
    """Matches SparseAutoencoder._initialize_weights, but stores weights in
    [in_features, out_features] layout so no per-call transpose is needed."""
    bound = (6.0 / (input_dim + hidden_dim)) ** 0.5        # xavier_uniform_ bound
    # encoder.weight.T  -> (D, H)
    w_enc_io = jax.random.uniform(key, (input_dim, hidden_dim),
                                  minval=-bound, maxval=bound, dtype=jnp.float32)
    b_enc = jnp.full((hidden_dim,), -0.1, dtype=jnp.float32)
    # decoder.weight = encoder.weight.T  =>  decoder.weight.T ([in,out]) = encoder.weight
    w_dec_io = w_enc_io.T                                  # (H, D)
    b_dec = jnp.zeros((input_dim,), dtype=jnp.float32)
    return w_enc_io, b_enc, w_dec_io, b_dec


def sae_forward_ref(x, w_enc_io, b_enc, w_dec_io, b_dec, sparsity_coeff=0.001):
    """Pure-JAX reference. With f32 weights this is exactly the PyTorch math;
    with bf16 weights it mirrors the kernel's bf16-operand / f32-accum path."""
    pre = jnp.dot(x.astype(w_enc_io.dtype), w_enc_io,
                  preferred_element_type=jnp.float32) + b_enc.astype(jnp.float32)
    hidden = jnp.maximum(pre, 0.0)
    recon = jnp.dot(hidden.astype(w_dec_io.dtype), w_dec_io,
                    preferred_element_type=jnp.float32) + b_dec.astype(jnp.float32)
    recon_loss = jnp.mean((recon - x.astype(jnp.float32)) ** 2)
    sparsity_loss = sparsity_coeff * jnp.mean(jnp.abs(hidden))
    return recon, hidden, recon_loss + sparsity_loss


if __name__ == "__main__":
    key = jax.random.PRNGKey(0)
    k_w, k_x = jax.random.split(key)

    # Small but lane-aligned demo shapes (D, H multiples of 128; batch mult of 8).
    batch, input_dim, hidden_dim = 64, 256, 512
    sparsity_coeff = 0.001

    w_enc_io, b_enc, w_dec_io, b_dec = init_sae_params(k_w, input_dim, hidden_dim)
    # Cast MXU operands to bf16 once (parameter prep, not per step).
    w_enc_bf = w_enc_io.astype(jnp.bfloat16)
    w_dec_bf = w_dec_io.astype(jnp.bfloat16)

    x = jax.random.normal(k_x, (batch, input_dim), dtype=jnp.float32)

    # JAX references: same bf16 MXU operands (tight check) and full f32 (module semantics).
    recon_r, hidden_r, loss_r = sae_forward_ref(
        x, w_enc_bf, b_enc, w_dec_bf, b_dec, sparsity_coeff)
    recon_f, hidden_f, loss_f = sae_forward_ref(
        x, w_enc_io, b_enc, w_dec_io, b_dec, sparsity_coeff)

    configs = [
        dict(),                                  # auto tiles (weights-resident, nh == 1)
        dict(batch_tile=32, h_tile=256),         # forced multi-tile path (nb=2, nh=2)
    ]
    for cfg in configs:
        recon, hidden, total_loss = sae_forward(
            x, w_enc_bf, b_enc, w_dec_bf, b_dec,
            sparsity_coeff=sparsity_coeff, **cfg)
        jax.block_until_ready((recon, hidden, total_loss))
        hidden32 = hidden.astype(jnp.float32)

        # Check 1: against a JAX reference using the same bf16 MXU operands.
        assert jnp.allclose(recon, recon_r, atol=2e-3, rtol=2e-3), cfg
        assert jnp.allclose(hidden32, hidden_r, atol=2e-2, rtol=2e-2), cfg
        assert jnp.allclose(total_loss, loss_r, atol=1e-3, rtol=1e-3), cfg

        # Check 2: against the full-f32 module semantics (loose tol: bf16 operands).
        assert jnp.allclose(recon, recon_f, atol=5e-2, rtol=5e-2), cfg
        assert jnp.allclose(hidden32, hidden_f, atol=5e-2, rtol=5e-2), cfg
        assert jnp.allclose(total_loss, loss_f, atol=5e-2, rtol=5e-2), cfg

    print("KERNEL_OK")
</pallas_src>

<mosaic_0001>
module attributes {stable_mosaic.version = 11 : i64} {
  func.func @_sae_kernel(%arg0: i32, %arg1: i32, %arg2: memref<64x256xf32, #tpu.memory_space<vmem>>, %arg3: memref<256x512xbf16, #tpu.memory_space<vmem>>, %arg4: memref<1x512xf32, #tpu.memory_space<vmem>>, %arg5: memref<512x256xbf16, #tpu.memory_space<vmem>>, %arg6: memref<1x256xf32, #tpu.memory_space<vmem>>, %arg7: memref<64x256xf32, #tpu.memory_space<vmem>>, %arg8: memref<64x512xbf16, #tpu.memory_space<vmem>>, %arg9: memref<1x8x256xf32, #tpu.memory_space<vmem>>, %arg10: memref<1x8x512xf32, #tpu.memory_space<vmem>>, %arg11: memref<64x256xbf16, #tpu.memory_space<vmem>>) attributes {dimension_semantics = [#tpu.dimension_semantics<parallel>, #tpu.dimension_semantics<arbitrary>], iteration_bounds = array<i64: 1, 1>, scalar_prefetch = 0 : i64, scratch_operands = 1 : i64, tpu.core_type = #tpu.core_type<tc>, window_params = [{transform_indices = @transform_0, window_bounds = array<i64: 64, 256>}, {transform_indices = @transform_1, window_bounds = array<i64: 256, 512>}, {transform_indices = @transform_2, window_bounds = array<i64: 1, 512>}, {transform_indices = @transform_3, window_bounds = array<i64: 512, 256>}, {pipeline_mode = #tpu.pipeline_mode<synchronous>, transform_indices = @transform_4, window_bounds = array<i64: 1, 256>}, {transform_indices = @transform_5, window_bounds = array<i64: 64, 256>}, {transform_indices = @transform_6, window_bounds = array<i64: 64, 512>}, {transform_indices = @transform_7, window_bounds = array<i64: 1, 8, 256>}, {transform_indices = @transform_8, window_bounds = array<i64: 1, 8, 512>}]} {
    %c0_i32 = arith.constant 0 : i32
    %0 = arith.cmpi eq, %arg1, %c0_i32 : i32
    %1 = arith.extui %0 : i1 to i32
    %c0_i32_0 = arith.constant 0 : i32
    %2 = arith.cmpi ne, %1, %c0_i32_0 : i32
    scf.if %2 {
      %c0_25 = arith.constant 0 : index
      %c0_26 = arith.constant 0 : index
      %31 = vector.load %arg2[%c0_25, %c0_26] : memref<64x256xf32, #tpu.memory_space<vmem>>, vector<64x256xf32>
      %32 = arith.truncf %31 : vector<64x256xf32> to vector<64x256xbf16>
      %c0_27 = arith.constant 0 : index
      %c0_28 = arith.constant 0 : index
      %33 = vector.load %arg11[%c0_27, %c0_28] : memref<64x256xbf16, #tpu.memory_space<vmem>>, vector<64x256xbf16>
      tpu.vector_store %arg11[%c0_27, %c0_28], %32 {strides = array<i32>} : memref<64x256xbf16, #tpu.memory_space<vmem>>, vector<64x256xbf16>,
      %cst_29 = arith.constant 0.000000e+00 : f32
      %34 = vector.broadcast %cst_29 : f32 to vector<1x8x512xf32>
      %c0_30 = arith.constant 0 : index
      %c0_31 = arith.constant 0 : index
      %c0_32 = arith.constant 0 : index
      %35 = vector.load %arg10[%c0_30, %c0_31, %c0_32] : memref<1x8x512xf32, #tpu.memory_space<vmem>>, vector<1x8x512xf32>
      tpu.vector_store %arg10[%c0_30, %c0_31, %c0_32], %34 {strides = array<i32>} : memref<1x8x512xf32, #tpu.memory_space<vmem>>, vector<1x8x512xf32>,
    } else {
    }
    %c0 = arith.constant 0 : index
    %c0_1 = arith.constant 0 : index
    %3 = vector.load %arg11[%c0, %c0_1] : memref<64x256xbf16, #tpu.memory_space<vmem>>, vector<64x256xbf16>
    %c0_2 = arith.constant 0 : index
    %c0_3 = arith.constant 0 : index
    %4 = vector.load %arg3[%c0_2, %c0_3] : memref<256x512xbf16, #tpu.memory_space<vmem>>, vector<256x512xbf16>
    %cst = arith.constant dense<0.000000e+00> : vector<64x512xf32>
    %5 = tpu.matmul %3, %4, %cst {dimension_numbers = #tpu.dot_dimension_numbers<[1], [0], [0], [1], [0, 0, 1, 1], [], []>} : vector<64x256xbf16>, vector<256x512xbf16>, vector<64x512xf32> -> vector<64x512xf32>
    %c0_4 = arith.constant 0 : index
    %c0_5 = arith.constant 0 : index
    %6 = vector.load %arg4[%c0_4, %c0_5] : memref<1x512xf32, #tpu.memory_space<vmem>>, vector<1x512xf32>
    %7 = vector.broadcast %6 : vector<1x512xf32> to vector<64x512xf32>
    %8 = arith.addf %5, %7 : vector<64x512xf32>
    %cst_6 = arith.constant 0.000000e+00 : f32
    %9 = vector.broadcast %cst_6 : f32 to vector<64x512xf32>
    %10 = arith.maximumf %8, %9 : vector<64x512xf32>
    %11 = arith.truncf %10 : vector<64x512xf32> to vector<64x512xbf16>
    %c0_7 = arith.constant 0 : index
    %c0_8 = arith.constant 0 : index
    %12 = vector.load %arg8[%c0_7, %c0_8] : memref<64x512xbf16, #tpu.memory_space<vmem>>, vector<64x512xbf16>
    tpu.vector_store %arg8[%c0_7, %c0_8], %11 {strides = array<i32>} : memref<64x512xbf16, #tpu.memory_space<vmem>>, vector<64x512xbf16>,
    %c0_9 = arith.constant 0 : index
    %c0_10 = arith.constant 0 : index
    %c0_11 = arith.constant 0 : index
    %13 = vector.load %arg10[%c0_9, %c0_10, %c0_11] : memref<1x8x512xf32, #tpu.memory_space<vmem>>, vector<1x8x512xf32>
    %14 = vector.shape_cast %10 : vector<64x512xf32> to vector<8x8x512xf32>
    %cst_12 = arith.constant dense<0.000000e+00> : vector<8x512xf32>
    %15 = vector.multi_reduction <add>, %14, %cst_12 [0] : vector<8x8x512xf32> to vector<8x512xf32>
    %16 = vector.shape_cast %15 : vector<8x512xf32> to vector<1x8x512xf32>
    %17 = arith.addf %13, %16 : vector<1x8x512xf32>
    %c0_13 = arith.constant 0 : index
    %c0_14 = arith.constant 0 : index
    %c0_15 = arith.constant 0 : index
    %18 = vector.load %arg10[%c0_13, %c0_14, %c0_15] : memref<1x8x512xf32, #tpu.memory_space<vmem>>, vector<1x8x512xf32>
    tpu.vector_store %arg10[%c0_13, %c0_14, %c0_15], %17 {strides = array<i32>} : memref<1x8x512xf32, #tpu.memory_space<vmem>>, vector<1x8x512xf32>,
    %19 = arith.truncf %10 : vector<64x512xf32> to vector<64x512xbf16>
    %c0_16 = arith.constant 0 : index
    %c0_17 = arith.constant 0 : index
    %20 = vector.load %arg5[%c0_16, %c0_17] : memref<512x256xbf16, #tpu.memory_space<vmem>>, vector<512x256xbf16>
    %cst_18 = arith.constant dense<0.000000e+00> : vector<64x256xf32>
    %21 = tpu.matmul %19, %20, %cst_18 {dimension_numbers = #tpu.dot_dimension_numbers<[1], [0], [0], [1], [0, 0, 1, 1], [], []>} : vector<64x512xbf16>, vector<512x256xbf16>, vector<64x256xf32> -> vector<64x256xf32>
    %c0_i32_19 = arith.constant 0 : i32
    %22 = arith.cmpi eq, %arg1, %c0_i32_19 : i32
    %23 = arith.extui %22 : i1 to i32
    %c0_i32_20 = arith.constant 0 : i32
    %24 = arith.cmpi ne, %23, %c0_i32_20 : i32
    scf.if %24 {
      %c0_25 = arith.constant 0 : index
      %c0_26 = arith.constant 0 : index
      %31 = vector.load %arg7[%c0_25, %c0_26] : memref<64x256xf32, #tpu.memory_space<vmem>>, vector<64x256xf32>
      tpu.vector_store %arg7[%c0_25, %c0_26], %21 {strides = array<i32>} : memref<64x256xf32, #tpu.memory_space<vmem>>, vector<64x256xf32>,
    } else {
    }
    %c0_i32_21 = arith.constant 0 : i32
    %25 = arith.cmpi sgt, %arg1, %c0_i32_21 : i32
    %26 = arith.extui %25 : i1 to i32
    %c0_i32_22 = arith.constant 0 : i32
    %27 = arith.cmpi ne, %26, %c0_i32_22 : i32
    scf.if %27 {
      %c0_25 = arith.constant 0 : index
      %c0_26 = arith.constant 0 : index
      %31 = vector.load %arg7[%c0_25, %c0_26] : memref<64x256xf32, #tpu.memory_space<vmem>>, vector<64x256xf32>
      %32 = arith.addf %31, %21 : vector<64x256xf32>
      %c0_27 = arith.constant 0 : index
      %c0_28 = arith.constant 0 : index
      %33 = vector.load %arg7[%c0_27, %c0_28] : memref<64x256xf32, #tpu.memory_space<vmem>>, vector<64x256xf32>
      tpu.vector_store %arg7[%c0_27, %c0_28], %32 {strides = array<i32>} : memref<64x256xf32, #tpu.memory_space<vmem>>, vector<64x256xf32>,
    } else {
    }
    %c0_i32_23 = arith.constant 0 : i32
    %28 = arith.cmpi eq, %arg1, %c0_i32_23 : i32
    %29 = arith.extui %28 : i1 to i32
    %c0_i32_24 = arith.constant 0 : i32
    %30 = arith.cmpi ne, %29, %c0_i32_24 : i32
    scf.if %30 {
      %c0_25 = arith.constant 0 : index
      %c0_26 = arith.constant 0 : index
      %31 = vector.load %arg7[%c0_25, %c0_26] : memref<64x256xf32, #tpu.memory_space<vmem>>, vector<64x256xf32>
      %c0_27 = arith.constant 0 : index
      %c0_28 = arith.constant 0 : index
      %32 = vector.load %arg6[%c0_27, %c0_28] : memref<1x256xf32, #tpu.memory_space<vmem>>, vector<1x256xf32>
      %33 = vector.broadcast %32 : vector<1x256xf32> to vector<64x256xf32>
      %34 = arith.addf %31, %33 : vector<64x256xf32>
      %c0_29 = arith.constant 0 : index
      %c0_30 = arith.constant 0 : index
      %35 = vector.load %arg7[%c0_29, %c0_30] : memref<64x256xf32, #tpu.memory_space<vmem>>, vector<64x256xf32>
      tpu.vector_store %arg7[%c0_29, %c0_30], %34 {strides = array<i32>} : memref<64x256xf32, #tpu.memory_space<vmem>>, vector<64x256xf32>,
      %c0_31 = arith.constant 0 : index
      %c0_32 = arith.constant 0 : index
      %36 = vector.load %arg2[%c0_31, %c0_32] : memref<64x256xf32, #tpu.memory_space<vmem>>, vector<64x256xf32>
      %37 = arith.subf %34, %36 : vector<64x256xf32>
      %38 = arith.mulf %37, %37 : vector<64x256xf32>
      %39 = vector.shape_cast %38 : vector<64x256xf32> to vector<8x8x256xf32>
      %cst_33 = arith.constant dense<0.000000e+00> : vector<8x256xf32>
      %40 = vector.multi_reduction <add>, %39, %cst_33 [0] : vector<8x8x256xf32> to vector<8x256xf32>
      %41 = vector.shape_cast %40 : vector<8x256xf32> to vector<1x8x256xf32>
      %c0_34 = arith.constant 0 : index
      %c0_35 = arith.constant 0 : index
      %c0_36 = arith.constant 0 : index
      %42 = vector.load %arg9[%c0_34, %c0_35, %c0_36] : memref<1x8x256xf32, #tpu.memory_space<vmem>>, vector<1x8x256xf32>
      tpu.vector_store %arg9[%c0_34, %c0_35, %c0_36], %41 {strides = array<i32>} : memref<1x8x256xf32, #tpu.memory_space<vmem>>, vector<1x8x256xf32>,
    } else {
    }
    return
  }
  func.func @transform_0(%arg0: i32, %arg1: i32) -> (i32, i32) {
    %c0_i32 = arith.constant 0 : i32
    %c0_i32_0 = arith.constant 0 : i32
    return %arg0, %c0_i32 : i32, i32
  }
  func.func @transform_1(%arg0: i32, %arg1: i32) -> (i32, i32) {
    %c0_i32 = arith.constant 0 : i32
    %c0_i32_0 = arith.constant 0 : i32
    return %c0_i32, %arg1 : i32, i32
  }
  func.func @transform_2(%arg0: i32, %arg1: i32) -> (i32, i32) {
    %c0_i32 = arith.constant 0 : i32
    %c0_i32_0 = arith.constant 0 : i32
    return %c0_i32, %arg1 : i32, i32
  }
  func.func @transform_3(%arg0: i32, %arg1: i32) -> (i32, i32) {
    %c0_i32 = arith.constant 0 : i32
    %c0_i32_0 = arith.constant 0 : i32
    return %arg1, %c0_i32 : i32, i32
  }
  func.func @transform_4(%arg0: i32, %arg1: i32) -> (i32, i32) {
    %c0_i32 = arith.constant 0 : i32
    %c0_i32_0 = arith.constant 0 : i32
    %c0_i32_1 = arith.constant 0 : i32
    return %c0_i32, %c0_i32_0 : i32, i32
  }
  func.func @transform_5(%arg0: i32, %arg1: i32) -> (i32, i32) {
    %c0_i32 = arith.constant 0 : i32
    %c0_i32_0 = arith.constant 0 : i32
    return %arg0, %c0_i32 : i32, i32
  }
  func.func @transform_6(%arg0: i32, %arg1: i32) -> (i32, i32) {
    %c0_i32 = arith.constant 0 : i32
    return %arg0, %arg1 : i32, i32
  }
  func.func @transform_7(%arg0: i32, %arg1: i32) -> (i32, i32, i32) {
    %c0_i32 = arith.constant 0 : i32
    %c0_i32_0 = arith.constant 0 : i32
    %c0_i32_1 = arith.constant 0 : i32
    return %arg0, %c0_i32, %c0_i32_0 : i32, i32, i32
  }
  func.func @transform_8(%arg0: i32, %arg1: i32) -> (i32, i32, i32) {
    %c0_i32 = arith.constant 0 : i32
    %c0_i32_0 = arith.constant 0 : i32
    %c0_i32_1 = arith.constant 0 : i32
    return %arg0, %c0_i32, %c0_i32_0 : i32, i32, i32
  }
}

</mosaic_0001>

<bundles_post_ra>
// kernel: tpu_custom_call.1
= control target key start
LH: loop header
LB: loop body
LE: loop exit
PB: predicated region body
PF: predicated region fallthrough
CT: control target
= control target key end

     0   :  { %14 = vsyncpa [#allocation4], 0  ;;  %s3162_s0 = inlined_call_operand.hbm [shape: f32[64,256], index: 0, kind: input, shape index: {}]   ;;  %s3163_s1 = inlined_call_operand.hbm [shape: bf16[256,512], index: 1, kind: input, shape index: {}]   ;;  %s3164_s2 = inlined_call_operand.hbm [shape: f32[1,512], index: 2, kind: input, shape index: {}]   ;;  %s3165_s3 = inlined_call_operand.hbm [shape: bf16[512,256], index: 3, kind: input, shape index: {}]   ;;  %s3166_s4 = inlined_call_operand.vmem [shape: f32[1,256], index: 4, kind: input, shape index: {}]   ;;  %s3167_s5 = inlined_call_operand.hbm [shape: f32[64,256], index: 5, kind: output, shape index: {0}]   ;;  %s3168_s6 = inlined_call_operand.hbm [shape: bf16[64,512], index: 6, kind: output, shape index: {1}]   ;;  %s3169_s7 = inlined_call_operand.hbm [shape: f32[1,8,256], index: 7, kind: output, shape index: {2}]   ;;  %s3170_s8 = inlined_call_operand.hbm [shape: f32[1,8,512], index: 8, kind: output, shape index: {3}]  }
   0x1   :  { %15 = vsyncpa [#allocation7], 0 }
   0x2   :  { %16 = vsyncpa [#allocation10], 0 }
   0x3   :  { %17 = vsyncpa [#allocation5], 0 }
   0x4   :  { %18 = vsyncpa [#allocation13], 0 }
   0x5   :  { %19 = vsyncpa [#allocation16], 0  ;;  %s37_s29 = sshll.u32 %s3163_s1, 4  ;;  %s2761_s30 = smov [#allocation6]   ;;  %s38_s29 = int_to_ptr.hbm [resolvable:$true] %s37_s29 }
   0x6   :  { %s39_s9 = sshll.u32 %s2761_s30, 4  ;;  %s24_s12 = sshll.u32 %s3162_s0, 4  ;;  %s40_s9 = int_to_ptr.vmem [resolvable:$true] %s39_s9  ;;  %s25_s12 = int_to_ptr.hbm [resolvable:$true] %s24_s12 }
   0x7   :  { %s2762_s13 = smov 256   ;;  %s2763_s14 = smov 16  }
   0x8   :  { %45 = dma.hbm_to_vmem [thread:$0]  %s38_s29, 8192, %s40_s9, [#allocation7], %s2762_s13, %s2762_s13, %s2763_s14  }
   0x9   :  { %s2764_s15 = smov [#allocation3]   ;;  %s51_s1 = sshll.u32 %s3164_s2, 4  ;;  %s52_s1 = int_to_ptr.hbm [resolvable:$true] %s51_s1 }
   0xa   :  { %s26_s16 = sshll.u32 %s2764_s15, 4  ;;  %s61_s20 = sshll.u32 %s3165_s3, 4  ;;  %s27_s16 = int_to_ptr.vmem [resolvable:$true] %s26_s16  ;;  %s62_s20 = int_to_ptr.hbm [resolvable:$true] %s61_s20 }
   0xb   :  { %32 = dma.hbm_to_vmem [thread:$0]  %s25_s12, 2048, %s27_s16, [#allocation4], %s2762_s13, %s2762_s13, %s2763_s14  }
   0xc   :  { %s2765_s21 = smov [#allocation8]   ;;  %s2766_s23 = smov [#allocation9]  }
   0xd   :  { %s53_s22 = sshll.u32 %s2765_s21, 4  ;;  %s63_s24 = sshll.u32 %s2766_s23, 4  ;;  %s54_s22 = int_to_ptr.vmem [resolvable:$true] %s53_s22  ;;  %s64_s24 = int_to_ptr.vmem [resolvable:$true] %s63_s24 }
   0xe   :  { %56 = dma.hbm_to_vmem [thread:$0]  %s52_s1, 64, %s54_s22, [#allocation7]  }
   0xf   :  { %s2767_s25 = smov 128   ;;  %s2768_s2 = smov 8  }
  0x10   :  { %69 = dma.hbm_to_vmem [thread:$0]  %s62_s20, 8192, %s64_s24, [#allocation10], %s2767_s25, %s2767_s25, %s2768_s2  }
  0x11   :  { %2749 = dma.done.wait [#allocation4], 2048  }
  0x12   :  { %2750 = vsyncadd [#allocation4], 4294965248 }
  0x13   :  { %2751 = dma.done.wait [#allocation7], 8256  }
  0x14   :  { %2752 = vsyncadd [#allocation7], 4294959040 }
  0x15   :  { %2753 = dma.done.wait [#allocation10], 8192  }
  0x16   :  { %2754 = vsyncadd [#allocation10], 4294959104  ;;  %v2010_v0 = vld [vmem:[#allocation6 + $0xe0] sm:$0xf]  ;;  %v2446_v1 = vld [vmem:[#allocation6 + $0xec] sm:$0xf0] }
  0x17   :  { %v2138_v2 = vld [vmem:[#allocation6 + $0x1e0] sm:$0xf]  ;;  %v2011_v3 = vor.u32 %v2446_v1, %v2010_v0  ;;  %v2478_v4 = vld [vmem:[#allocation6 + $0x1ec] sm:$0xf0]  ;;  %v2444_v5 = vld [vmem:[#allocation6 + $0xe4] sm:$0xf] }
  0x18   :  { %v2012_v6 = vld [vmem:[#allocation6 + $0xf0] sm:$0xf0]  ;;  %v2139_v7 = vor.u32 %v2478_v4, %v2138_v2  ;;  %v2476_v9 = vld [vmem:[#allocation6 + $0x1e4] sm:$0xf]  ;;  %v1994_v11 = vld [vmem:[#allocation6 + $0xc0] sm:$0xf] }
  0x19   :  { %v2015_v8 = vor.u32 %v2444_v5, %v2012_v6  ;;  %v2140_v10 = vld [vmem:[#allocation6 + $0x1f0] sm:$0xf0]  ;;  %570 = vmatpush.bf16.msra.mxu0 %v2011_v3  ;;  %v2442_v13 = vld [vmem:[#allocation6 + $0xcc] sm:$0xf0]  ;;  %v2122_v14 = vld [vmem:[#allocation6 + $0x1c0] sm:$0xf] }
  0x1a   :  { %v2143_v12 = vor.u32 %v2476_v9, %v2140_v10  ;;  %v2474_v15 = vld [vmem:[#allocation6 + $0x1cc] sm:$0xf0]  ;;  %599 = vmatpush.bf16.msra.mxu1 %v2139_v7  ;;  %v1995_v16 = vor.u32 %v2442_v13, %v1994_v11  ;;  %v2440_v18 = vld [vmem:[#allocation6 + $0xc4] sm:$0xf]  ;;  %v1996_v19 = vld [vmem:[#allocation6 + $0xd0] sm:$0xf0] }
  0x1b   :  { %628 = vmatpush.bf16.msra.mxu2 %v2015_v8  ;;  %v2123_v17 = vor.u32 %v2474_v15, %v2122_v14  ;;  %v2472_v20 = vld [vmem:[#allocation6 + $0x1c4] sm:$0xf]  ;;  %v1999_v21 = vor.u32 %v2440_v18, %v1996_v19  ;;  %v2124_v22 = vld [vmem:[#allocation6 + $0x1d0] sm:$0xf0]  ;;  %v1978_v23 = vld [vmem:[#allocation6 + $0xa0] sm:$0xf] }
  0x1c   :  { %657 = vmatpush.bf16.msra.mxu3 %v2143_v12  ;;  %v2438_v24 = vld [vmem:[#allocation6 + $0xac] sm:$0xf0]  ;;  %v2127_v25 = vor.u32 %v2472_v20, %v2124_v22  ;;  %v2106_v26 = vld [vmem:[#allocation6 + $0x1a0] sm:$0xf]  ;;  %v2436_v28 = vld [vmem:[#allocation6 + $0xa4] sm:$0xf] }
  0x1d   :  { %v2470_v27 = vld [vmem:[#allocation6 + $0x1ac] sm:$0xf0]  ;;  %571 = vmatpush.bf16.msra.mxu0 %v1995_v16  ;;  %v1979_v29 = vor.u32 %v2438_v24, %v1978_v23  ;;  %v1980_v30 = vld [vmem:[#allocation6 + $0xb0] sm:$0xf0]  ;;  %v2468_v31 = vld [vmem:[#allocation6 + $0x1a4] sm:$0xf] }
  0x1e   :  { %v2108_v32 = vld [vmem:[#allocation6 + $0x1b0] sm:$0xf0]  ;;  %600 = vmatpush.bf16.msra.mxu1 %v2123_v17  ;;  %v2107_v33 = vor.u32 %v2470_v27, %v2106_v26  ;;  %v1983_v34 = vor.u32 %v2436_v28, %v1980_v30  ;;  %v1962_v35 = vld [vmem:[#allocation6 + $0x80] sm:$0xf]  ;;  %v2434_v36 = vld [vmem:[#allocation6 + $0x8c] sm:$0xf0] }
  0x1f   :  { %629 = vmatpush.bf16.msra.mxu2 %v1999_v21  ;;  %v2090_v37 = vld [vmem:[#allocation6 + $0x180] sm:$0xf]  ;;  %v2111_v38 = vor.u32 %v2468_v31, %v2108_v32  ;;  %v2466_v39 = vld [vmem:[#allocation6 + $0x18c] sm:$0xf0]  ;;  %v2432_v40 = vld [vmem:[#allocation6 + $0x84] sm:$0xf]  ;;  %v1963_v44 = vor.u32 %v2434_v36, %v1962_v35 }
  0x20   :  { %658 = vmatpush.bf16.msra.mxu3 %v2127_v25  ;;  %v1964_v41 = vld [vmem:[#allocation6 + $0x90] sm:$0xf0]  ;;  %v2464_v42 = vld [vmem:[#allocation6 + $0x184] sm:$0xf]  ;;  %v2091_v45 = vor.u32 %v2466_v39, %v2090_v37  ;;  %v1946_v47 = vld [vmem:[#allocation6 + $0x60] sm:$0xf] }
  0x21   :  { %v2092_v43 = vld [vmem:[#allocation6 + $0x190] sm:$0xf0]  ;;  %572 = vmatpush.bf16.msra.mxu0 %v1979_v29  ;;  %v1967_v46 = vor.u32 %v2432_v40, %v1964_v41  ;;  %v2430_v48 = vld [vmem:[#allocation6 + $0x6c] sm:$0xf0]  ;;  %v2074_v49 = vld [vmem:[#allocation6 + $0x160] sm:$0xf] }
  0x22   :  { %601 = vmatpush.bf16.msra.mxu1 %v2107_v33  ;;  %v2095_v50 = vor.u32 %v2464_v42, %v2092_v43  ;;  %v2462_v51 = vld [vmem:[#allocation6 + $0x16c] sm:$0xf0]  ;;  %v2428_v52 = vld [vmem:[#allocation6 + $0x64] sm:$0xf]  ;;  %v1948_v53 = vld [vmem:[#allocation6 + $0x70] sm:$0xf0]  ;;  %v1947_v56 = vor.u32 %v2430_v48, %v1946_v47 }
  0x23   :  { %630 = vmatpush.bf16.msra.mxu2 %v1983_v34  ;;  %v2460_v54 = vld [vmem:[#allocation6 + $0x164] sm:$0xf]  ;;  %v2076_v55 = vld [vmem:[#allocation6 + $0x170] sm:$0xf0]  ;;  %v2075_v57 = vor.u32 %v2462_v51, %v2074_v49  ;;  %v1951_v58 = vor.u32 %v2428_v52, %v1948_v53  ;;  %v1930_v59 = vld [vmem:[#allocation6 + $0x40] sm:$0xf] }
  0x24   :  { %659 = vmatpush.bf16.msra.mxu3 %v2111_v38  ;;  %v2426_v60 = vld [vmem:[#allocation6 + $0x4c] sm:$0xf0]  ;;  %v2058_v61 = vld [vmem:[#allocation6 + $0x140] sm:$0xf]  ;;  %v2079_v62 = vor.u32 %v2460_v54, %v2076_v55  ;;  %v2424_v0 = vld [vmem:[#allocation6 + $0x44] sm:$0xf] }
  0x25   :  { %573 = vmatpush.bf16.msra.mxu0 %v1963_v44  ;;  %v2458_v63 = vld [vmem:[#allocation6 + $0x14c] sm:$0xf0]  ;;  %v1932_v1 = vld [vmem:[#allocation6 + $0x50] sm:$0xf0]  ;;  %v2456_v2 = vld [vmem:[#allocation6 + $0x144] sm:$0xf]  ;;  %v1931_v5 = vor.u32 %v2426_v60, %v1930_v59 }
  0x26   :  { %602 = vmatpush.bf16.msra.mxu1 %v2091_v45  ;;  %v2060_v3 = vld [vmem:[#allocation6 + $0x150] sm:$0xf0]  ;;  %v1914_v4 = vld [vmem:[#allocation6 + $0x20] sm:$0xf]  ;;  %v2422_v6 = vld [vmem:[#allocation6 + $0x2c] sm:$0xf0]  ;;  %v2059_v9 = vor.u32 %v2458_v63, %v2058_v61  ;;  %v1935_v10 = vor.u32 %v2424_v0, %v1932_v1 }
  0x27   :  { %631 = vmatpush.bf16.msra.mxu2 %v1967_v46  ;;  %v2042_v7 = vld [vmem:[#allocation6 + $0x120] sm:$0xf]  ;;  %v2454_v8 = vld [vmem:[#allocation6 + $0x12c] sm:$0xf0]  ;;  %v2420_v11 = vld [vmem:[#allocation6 + $0x24] sm:$0xf]  ;;  %v2063_v14 = vor.u32 %v2456_v2, %v2060_v3  ;;  %v1915_v23 = vor.u32 %v2422_v6, %v1914_v4 }
  0x28   :  { %660 = vmatpush.bf16.msra.mxu3 %v2095_v50  ;;  %v1916_v12 = vld [vmem:[#allocation6 + $0x30] sm:$0xf0]  ;;  %v2452_v13 = vld [vmem:[#allocation6 + $0x124] sm:$0xf]  ;;  %v93_v17 = vld [vmem:[#allocation3 + $0x8] sm:$0xff]  ;;  %v2043_v28 = vor.u32 %v2454_v8, %v2042_v7  ;;  %s1813_s29 = sshll.u32 %s3168_s6, 4  ;;  %s1814_s29 = int_to_ptr.hbm [resolvable:$true] %s1813_s29 }
  0x29   :  { %574 = vmatpush.bf16.msra.mxu0 %v1947_v56  ;;  %v2044_v15 = vld [vmem:[#allocation6 + $0x130] sm:$0xf0]  ;;  %v92_v16 = vld [vmem:[#allocation3] sm:$0xff]  ;;  %v2418_v19 = vld [vmem:[#allocation6 + $0xc] sm:$0xf0]  ;;  %v1919_v29 = vor.u32 %v2420_v11, %v1916_v12  ;;  %s2769_s30 = smov [#allocation12]  }
  0x2a   :  { %603 = vmatpush.bf16.msra.mxu1 %v2075_v57  ;;  %v1898_v18 = vld [vmem:[#allocation6] sm:$0xf]  ;;  %v94_v20 = vld [vmem:[#allocation3 + $0x10] sm:$0xff]  ;;  %v95_v21 = vld [vmem:[#allocation3 + $0x18] sm:$0xff]  ;;  %v108_v22 = vpack.c.bf16 %v93_v17, %v92_v16  ;;  %v2047_v33 = vor.u32 %v2452_v13, %v2044_v15  ;;  %s1811_s9 = sshll.u32 %s2769_s30, 4  ;;  %s1838_s12 = sshll.u32 %s3170_s8, 4  ;;  %s1812_s9 = int_to_ptr.vmem [resolvable:$true] %s1811_s9  ;;  %s1839_s12 = int_to_ptr.hbm [resolvable:$true] %s1838_s12 }
  0x2b   :  { %632 = vmatpush.bf16.msra.mxu2 %v1951_v58  ;;  %v2026_v24 = vld [vmem:[#allocation6 + $0x100] sm:$0xf]  ;;  %v2450_v25 = vld [vmem:[#allocation6 + $0x10c] sm:$0xf0]  ;;  %v2416_v26 = vld [vmem:[#allocation6 + $0x4] sm:$0xf]  ;;  %v109_v27 = vpack.c.bf16 %v95_v21, %v94_v20  ;;  %v1899_v41 = vor.u32 %v2418_v19, %v1898_v18 }
  0x2c   :  { %661 = vmatpush.bf16.msra.mxu3 %v2079_v62  ;;  %v1900_v30 = vld [vmem:[#allocation6 + $0x10] sm:$0xf0]  ;;  %v2448_v31 = vld [vmem:[#allocation6 + $0x104] sm:$0xf]  ;;  %116 = vst [vmem:[#allocation2] sm:$0xff] %v108_v22  ;;  %v97_v36 = vld [vmem:[#allocation3 + $0x28] sm:$0xff]  ;;  %v2027_v45 = vor.u32 %v2450_v25, %v2026_v24 }
  0x2d   :  { %575 = vmatpush.bf16.msra.mxu0 %v1931_v5  ;;  %v96_v32 = vld [vmem:[#allocation3 + $0x20] sm:$0xff]  ;;  %v2028_v34 = vld [vmem:[#allocation6 + $0x110] sm:$0xf0]  ;;  %117 = vst [vmem:[#allocation2 + $0x8] sm:$0xff] %v109_v27  ;;  %v2445_v35 = vld [vmem:[#allocation6 + $0xec] sm:$0xf]  ;;  %v1903_v46 = vor.u32 %v2416_v26, %v1900_v30 }
  0x2e   :  { %604 = vmatpush.bf16.msra.mxu1 %v2059_v9  ;;  %v2020_v37 = vld [vmem:[#allocation6 + $0xf8] sm:$0xf0]  ;;  %v2477_v38 = vld [vmem:[#allocation6 + $0x1ec] sm:$0xf]  ;;  %v110_v40 = vpack.c.bf16 %v97_v36, %v96_v32  ;;  %v2018_v42 = vld [vmem:[#allocation6 + $0xe8] sm:$0xf]  ;;  %v2031_v50 = vor.u32 %v2448_v31, %v2028_v34 }
  0x2f   :  { %633 = vmatpush.bf16.msra.mxu2 %v1935_v10  ;;  %v2148_v39 = vld [vmem:[#allocation6 + $0x1f8] sm:$0xf0]  ;;  %v2447_v43 = vld [vmem:[#allocation6 + $0xf4] sm:$0xf0]  ;;  %v2146_v44 = vld [vmem:[#allocation6 + $0x1e8] sm:$0xf]  ;;  %v2023_v51 = vor.u32 %v2445_v35, %v2020_v37 }
  0x30   :  { %662 = vmatpush.bf16.msra.mxu3 %v2063_v14  ;;  %v2479_v47 = vld [vmem:[#allocation6 + $0x1f4] sm:$0xf0]  ;;  %v98_v48 = vld [vmem:[#allocation3 + $0x30] sm:$0xff]  ;;  %118 = vst [vmem:[#allocation2 + $0x10] sm:$0xff] %v110_v40  ;;  %v2441_v52 = vld [vmem:[#allocation6 + $0xcc] sm:$0xf]  ;;  %v2151_v56 = vor.u32 %v2477_v38, %v2148_v39  ;;  %v2019_v57 = vor.u32 %v2447_v43, %v2018_v42 }
  0x31   :  { %576 = vmatpush.bf16.msra.mxu0 %v1915_v23  ;;  %v99_v49 = vld [vmem:[#allocation3 + $0x38] sm:$0xff]  ;;  %v2473_v54 = vld [vmem:[#allocation6 + $0x1cc] sm:$0xf]  ;;  %v2002_v59 = vld [vmem:[#allocation6 + $0xc8] sm:$0xf]  ;;  %v2147_v1 = vor.u32 %v2479_v47, %v2146_v44  ;;  %s2771_s8 = smov [#allocation11]  }
  0x32   :  { %605 = vmatpush.bf16.msra.mxu1 %v2043_v28  ;;  %v2004_v53 = vld [vmem:[#allocation6 + $0xd8] sm:$0xf0]  ;;  %v111_v55 = vpack.c.bf16 %v99_v49, %v98_v48  ;;  %v2443_v60 = vld [vmem:[#allocation6 + $0xd4] sm:$0xf0]  ;;  %v2130_v5 = vld [vmem:[#allocation6 + $0x1c8] sm:$0xf] }
  0x33   :  { %634 = vmatpush.bf16.msra.mxu2 %v1919_v29  ;;  %v2132_v58 = vld [vmem:[#allocation6 + $0x1d8] sm:$0xf0]  ;;  %v1866_v61 = vld [vmem:[#allocation2] sm:$0xf]  ;;  %v2408_v62 = vld [vmem:[#allocation2 + $0x4] sm:$0xf]  ;;  %v2007_v4 = vor.u32 %v2441_v52, %v2004_v53  ;;  %v2003_v9 = vor.u32 %v2443_v60, %v2002_v59 }
  0x34   :  { %663 = vmatpush.bf16.msra.mxu3 %v2047_v33  ;;  %119 = vst [vmem:[#allocation2 + $0x18] sm:$0xff] %v111_v55  ;;  %v2409_v63 = vld [vmem:[#allocation2 + $0x4] sm:$0xf0]  ;;  %v1868_v0 = vld [vmem:[#allocation2 + $0x8] sm:$0xf0]  ;;  %v2135_v8 = vor.u32 %v2473_v54, %v2132_v58  ;;  %v100_v12 = vld [vmem:[#allocation3 + $0x40] sm:$0xff] }
  0x35   :  { %577 = vmatpush.bf16.msra.mxu0 %v1899_v41  ;;  %v2836_v2 = vor.u32 %v2409_v63, %v1866_v61  ;;  %v2838_v3 = vor.u32 %v2408_v62, %v1868_v0  ;;  %v2475_v6 = vld [vmem:[#allocation6 + $0x1d4] sm:$0xf0]  ;;  %v2437_v7 = vld [vmem:[#allocation6 + $0xac] sm:$0xf]  ;;  %v1988_v10 = vld [vmem:[#allocation6 + $0xb8] sm:$0xf0] }
  0x36   :  { %606 = vmatpush.bf16.msra.mxu1 %v2027_v45  ;;  %v2469_v11 = vld [vmem:[#allocation6 + $0x1ac] sm:$0xf]  ;;  %v2116_v13 = vld [vmem:[#allocation6 + $0x1b8] sm:$0xf0]  ;;  %v1986_v14 = vld [vmem:[#allocation6 + $0xa8] sm:$0xf]  ;;  %v2131_v19 = vor.u32 %v2475_v6, %v2130_v5  ;;  %v1991_v20 = vor.u32 %v2437_v7, %v1988_v10 }
  0x37   :  { %635 = vmatpush.bf16.msra.mxu2 %v1903_v46  ;;  %v2439_v15 = vld [vmem:[#allocation6 + $0xb4] sm:$0xf0]  ;;  %v2114_v16 = vld [vmem:[#allocation6 + $0x1a8] sm:$0xf]  ;;  %v102_v18 = vld [vmem:[#allocation3 + $0x50] sm:$0xff]  ;;  %v2119_v25 = vor.u32 %v2469_v11, %v2116_v13  ;;  %s1798_s15 = sshll.u32 %s2771_s8, 4  ;;  %s1799_s15 = int_to_ptr.vmem [resolvable:$true] %s1798_s15 }
  0x38   :  { %664 = vmatpush.bf16.msra.mxu3 %v2031_v50  ;;  %578 = vmatmul.bf16.vlgmr.msra.gmra.mxu0 %v2836_v2  ;;  %v101_v17 = vld [vmem:[#allocation3 + $0x48] sm:$0xff]  ;;  %v2471_v21 = vld [vmem:[#allocation6 + $0x1b4] sm:$0xf0]  ;;  %v1987_v26 = vor.u32 %v2439_v15, %v1986_v14  ;;  %v1972_v27 = vld [vmem:[#allocation6 + $0x98] sm:$0xf0]  ;;  %s1800_s18 = sshll.u32 %s3167_s5, 4  ;;  %s1801_s18 = int_to_ptr.hbm [resolvable:$true] %s1800_s18 }
  0x39   :  { %686 = vmatpush.bf16.msrb.mxu0 %v2019_v57  ;;  %607 = vmatmul.bf16.vlgmr.msra.gmra.mxu1 %v2838_v3  ;;  %v2433_v22 = vld [vmem:[#allocation6 + $0x8c] sm:$0xf]  ;;  %v103_v23 = vld [vmem:[#allocation3 + $0x58] sm:$0xff]  ;;  %v112_v24 = vpack.c.bf16 %v101_v17, %v100_v12  ;;  %v1970_v31 = vld [vmem:[#allocation6 + $0x88] sm:$0xf]  ;;  %v2115_v35 = vor.u32 %v2471_v21, %v2114_v16  ;;  %s2772_s1 = smov [#allocation14]  }
  0x3a   :  { %636 = vmatmul.bf16.vlgmr.msra.gmra.mxu2 %v2836_v2  ;;  %715 = vmatpush.bf16.msrb.mxu1 %v2147_v1  ;;  %v2465_v28 = vld [vmem:[#allocation6 + $0x18c] sm:$0xf]  ;;  %v2100_v29 = vld [vmem:[#allocation6 + $0x198] sm:$0xf0]  ;;  %v113_v30 = vpack.c.bf16 %v103_v23, %v102_v18  ;;  %v2435_v32 = vld [vmem:[#allocation6 + $0x94] sm:$0xf0]  ;;  %v1975_v36 = vor.u32 %v2433_v22, %v1972_v27 }
  0x3b   :  { %744 = vmatpush.bf16.msrb.mxu2 %v2023_v51  ;;  %665 = vmatmul.bf16.vlgmr.msra.gmra.mxu3 %v2838_v3  ;;  %120 = vst [vmem:[#allocation2 + $0x20] sm:$0xff] %v112_v24  ;;  %v104_v33 = vld [vmem:[#allocation3 + $0x60] sm:$0xff]  ;;  %v105_v34 = vld [vmem:[#allocation3 + $0x68] sm:$0xff]  ;;  %v2467_v38 = vld [vmem:[#allocation6 + $0x194] sm:$0xf0]  ;;  %v2103_v43 = vor.u32 %v2465_v28, %v2100_v29  ;;  %v1971_v44 = vor.u32 %v2435_v32, %v1970_v31  ;;  %s1825_s0 = sshll.u32 %s2772_s1, 4  ;;  %s1826_s0 = int_to_ptr.vmem [resolvable:$true] %s1825_s0 }
  0x3c   :  { %773 = vmatpush.bf16.msrb.mxu3 %v2151_v56  ;;  %121 = vst [vmem:[#allocation2 + $0x28] sm:$0xff] %v113_v30  ;;  %v2098_v37 = vld [vmem:[#allocation6 + $0x188] sm:$0xf]  ;;  %v114_v39 = vpack.c.bf16 %v105_v34, %v104_v33  ;;  %v1874_v40 = vld [vmem:[#allocation2 + $0x10] sm:$0xf]  ;;  %v107_v53 = vld [vmem:[#allocation3 + $0x78] sm:$0xff] }
  0x3d   :  { %687 = vmatpush.bf16.msrb.mxu0 %v2003_v9  ;;  %v2411_v41 = vld [vmem:[#allocation2 + $0x14] sm:$0xf0]  ;;  %v2410_v42 = vld [vmem:[#allocation2 + $0x14] sm:$0xf]  ;;  %v2429_v45 = vld [vmem:[#allocation6 + $0x6c] sm:$0xf]  ;;  %v2099_v54 = vor.u32 %v2467_v38, %v2098_v37 }
  0x3e   :  { %716 = vmatpush.bf16.msrb.mxu1 %v2131_v19  ;;  %v1956_v46 = vld [vmem:[#allocation6 + $0x78] sm:$0xf0]  ;;  %v2461_v47 = vld [vmem:[#allocation6 + $0x16c] sm:$0xf]  ;;  %v1954_v49 = vld [vmem:[#allocation6 + $0x68] sm:$0xf]  ;;  %v2844_v1 = vor.u32 %v2411_v41, %v1874_v40 }
  0x3f   :  { %745 = vmatpush.bf16.msrb.mxu2 %v2007_v4  ;;  %v2084_v48 = vld [vmem:[#allocation6 + $0x178] sm:$0xf0]  ;;  %v2431_v50 = vld [vmem:[#allocation6 + $0x74] sm:$0xf0]  ;;  %v106_v52 = vld [vmem:[#allocation3 + $0x70] sm:$0xff]  ;;  %122 = vst [vmem:[#allocation2 + $0x30] sm:$0xff] %v114_v39  ;;  %v1959_v55 = vor.u32 %v2429_v45, %v1956_v46 }
  0x40   :  { %774 = vmatpush.bf16.msrb.mxu3 %v2135_v8  ;;  %v1876_v51 = vld [vmem:[#allocation2 + $0x18] sm:$0xf0]  ;;  %v2082_v56 = vld [vmem:[#allocation6 + $0x168] sm:$0xf]  ;;  %v2463_v57 = vld [vmem:[#allocation6 + $0x174] sm:$0xf0]  ;;  %v115_v59 = vpack.c.bf16 %v107_v53, %v106_v52  ;;  %v2087_v60 = vor.u32 %v2461_v47, %v2084_v48  ;;  %v1955_v61 = vor.u32 %v2431_v50, %v1954_v49 }
  0x41   :  { %688 = vmatpush.bf16.msrb.mxu0 %v1987_v26  ;;  %v2425_v58 = vld [vmem:[#allocation6 + $0x4c] sm:$0xf]  ;;  %v1940_v62 = vld [vmem:[#allocation6 + $0x58] sm:$0xf0]  ;;  %v2846_v4 = vor.u32 %v2410_v42, %v1876_v51  ;;  %v1938_v5 = vld [vmem:[#allocation6 + $0x48] sm:$0xf]  ;;  %v2083_v7 = vor.u32 %v2463_v57, %v2082_v56 }
  0x42   :  { %717 = vmatpush.bf16.msrb.mxu1 %v2115_v35  ;;  %v2457_v63 = vld [vmem:[#allocation6 + $0x14c] sm:$0xf]  ;;  %v2068_v0 = vld [vmem:[#allocation6 + $0x158] sm:$0xf0]  ;;  %v2427_v6 = vld [vmem:[#allocation6 + $0x54] sm:$0xf0]  ;;  %v1943_v8 = vor.u32 %v2425_v58, %v1940_v62 }
  0x43   :  { %746 = vmatpush.bf16.msrb.mxu2 %v1991_v20  ;;  %123 = vst [vmem:[#allocation2 + $0x38] sm:$0xff] %v115_v59  ;;  %v2071_v9 = vor.u32 %v2457_v63, %v2068_v0  ;;  %v1939_v10 = vor.u32 %v2427_v6, %v1938_v5  ;;  %v2066_v11 = vld [vmem:[#allocation6 + $0x148] sm:$0xf]  ;;  %v2459_v12 = vld [vmem:[#allocation6 + $0x154] sm:$0xf0]  ;;  %s1827_s21 = sshll.u32 %s3169_s7, 4  ;;  %s1828_s21 = int_to_ptr.hbm [resolvable:$true] %s1827_s21 }
  0x44   :  { %775 = vmatpush.bf16.msrb.mxu3 %v2119_v25  ;;  %v2421_v13 = vld [vmem:[#allocation6 + $0x2c] sm:$0xf]  ;;  %v2067_v14 = vor.u32 %v2459_v12, %v2066_v11  ;;  %v1924_v15 = vld [vmem:[#allocation6 + $0x38] sm:$0xf0]  ;;  %v1922_v20 = vld [vmem:[#allocation6 + $0x28] sm:$0xf] }
  0x45   :  { %689 = vmatpush.bf16.msrb.mxu0 %v1971_v44  ;;  %v2453_v16 = vld [vmem:[#allocation6 + $0x12c] sm:$0xf]  ;;  %v2052_v17 = vld [vmem:[#allocation6 + $0x138] sm:$0xf0]  ;;  %v1927_v18 = vor.u32 %v2421_v13, %v1924_v15  ;;  %v2423_v21 = vld [vmem:[#allocation6 + $0x34] sm:$0xf0] }
  0x46   :  { %718 = vmatpush.bf16.msrb.mxu1 %v2099_v54  ;;  %v2055_v19 = vor.u32 %v2453_v16, %v2052_v17  ;;  %v2050_v22 = vld [vmem:[#allocation6 + $0x128] sm:$0xf]  ;;  %v2455_v23 = vld [vmem:[#allocation6 + $0x134] sm:$0xf0]  ;;  %v1923_v24 = vor.u32 %v2423_v21, %v1922_v20  ;;  %v2417_v25 = vld [vmem:[#allocation6 + $0xc] sm:$0xf] }
  0x47   :  { %747 = vmatpush.bf16.msrb.mxu2 %v1975_v36  ;;  %v1908_v26 = vld [vmem:[#allocation6 + $0x18] sm:$0xf0]  ;;  %v2449_v27 = vld [vmem:[#allocation6 + $0x10c] sm:$0xf]  ;;  %v2051_v28 = vor.u32 %v2455_v23, %v2050_v22  ;;  %v1906_v31 = vld [vmem:[#allocation6 + $0x8] sm:$0xf] }
  0x48   :  { %776 = vmatpush.bf16.msrb.mxu3 %v2103_v43  ;;  %583 = vmatmul.bf16.gmra.mxu0 %v2844_v1  ;;  %v1911_v29 = vor.u32 %v2417_v25, %v1908_v26  ;;  %v2036_v30 = vld [vmem:[#allocation6 + $0x118] sm:$0xf0]  ;;  %v2419_v32 = vld [vmem:[#allocation6 + $0x14] sm:$0xf0]  ;;  %v2034_v35 = vld [vmem:[#allocation6 + $0x108] sm:$0xf] }
  0x49   :  { %690 = vmatpush.bf16.msrb.mxu0 %v1955_v61  ;;  %612 = vmatmul.bf16.gmra.mxu1 %v2846_v4  ;;  %v2039_v33 = vor.u32 %v2449_v27, %v2036_v30  ;;  %v1907_v34 = vor.u32 %v2419_v32, %v1906_v31  ;;  %v2451_v36 = vld [vmem:[#allocation6 + $0x114] sm:$0xf0]  ;;  %v1882_v37 = vld [vmem:[#allocation2 + $0x20] sm:$0xf]  ;;  %v2413_v38 = vld [vmem:[#allocation2 + $0x24] sm:$0xf0] }
  0x4a   :  { %641 = vmatmul.bf16.gmra.mxu2 %v2844_v1  ;;  %719 = vmatpush.bf16.msrb.mxu1 %v2083_v7  ;;  %v2412_v39 = vld [vmem:[#allocation2 + $0x24] sm:$0xf]  ;;  %v1884_v40 = vld [vmem:[#allocation2 + $0x28] sm:$0xf0]  ;;  %v2035_v41 = vor.u32 %v2451_v36, %v2034_v35  ;;  %v1883_v42 = vor.u32 %v2413_v38, %v1882_v37  ;;  %v1890_v44 = vld [vmem:[#allocation2 + $0x30] sm:$0xf] }
  0x4b   :  { %748 = vmatpush.bf16.msrb.mxu2 %v1959_v55  ;;  %670 = vmatmul.bf16.gmra.mxu3 %v2846_v4  ;;  %v1887_v43 = vor.u32 %v2412_v39, %v1884_v40  ;;  %v2415_v45 = vld [vmem:[#allocation2 + $0x34] sm:$0xf0]  ;;  %v2414_v46 = vld [vmem:[#allocation2 + $0x34] sm:$0xf]  ;;  %v1892_v47 = vld [vmem:[#allocation2 + $0x38] sm:$0xf0] }
  0x4c   :  { %777 = vmatpush.bf16.msrb.mxu3 %v2087_v60  ;;  %v2852_v48 = vor.u32 %v2415_v45, %v1890_v44  ;;  %v2854_v49 = vor.u32 %v2414_v46, %v1892_v47  ;;  %v2210_v50 = vld [vmem:[#allocation9 + $0x70] sm:$0xf]  ;;  %v2495_v51 = vld [vmem:[#allocation9 + $0x74] sm:$0xf0]  ;;  %v2202_v56 = vld [vmem:[#allocation9 + $0x60] sm:$0xf] }
  0x4d   :  { %691 = vmatpush.bf16.msrb.mxu0 %v1939_v10  ;;  %v2274_v52 = vld [vmem:[#allocation9 + $0xf0] sm:$0xf]  ;;  %v2211_v53 = vor.u32 %v2495_v51, %v2210_v50  ;;  %v2511_v54 = vld [vmem:[#allocation9 + $0xf4] sm:$0xf0]  ;;  %v2266_v57 = vld [vmem:[#allocation9 + $0xe0] sm:$0xf] }
  0x4e   :  { %720 = vmatpush.bf16.msrb.mxu1 %v2067_v14  ;;  %v2275_v55 = vor.u32 %v2511_v54, %v2274_v52  ;;  %v2509_v58 = vld [vmem:[#allocation9 + $0xe4] sm:$0xf0]  ;;  %v2194_v60 = vld [vmem:[#allocation9 + $0x50] sm:$0xf]  ;;  %v2491_v61 = vld [vmem:[#allocation9 + $0x54] sm:$0xf0] }
  0x4f   :  { %749 = vmatpush.bf16.msrb.mxu2 %v1943_v8  ;;  %v2267_v59 = vor.u32 %v2509_v58, %v2266_v57  ;;  %v2258_v62 = vld [vmem:[#allocation9 + $0xd0] sm:$0xf]  ;;  %v2195_v63 = vor.u32 %v2491_v61, %v2194_v60  ;;  %v2507_v0 = vld [vmem:[#allocation9 + $0xd4] sm:$0xf0]  ;;  %v2489_v5 = vld [vmem:[#allocation9 + $0x44] sm:$0xf0] }
  0x50   :  { %778 = vmatpush.bf16.msrb.mxu3 %v2071_v9  ;;  %v2250_v6 = vld [vmem:[#allocation9 + $0xc0] sm:$0xf]  ;;  %v2505_v8 = vld [vmem:[#allocation9 + $0xc4] sm:$0xf0]  ;;  %v2178_v10 = vld [vmem:[#allocation9 + $0x30] sm:$0xf] }
  0x51   :  { %692 = vmatpush.bf16.msrb.mxu0 %v1923_v24  ;;  %v2251_v9 = vor.u32 %v2505_v8, %v2250_v6  ;;  %v2487_v11 = vld [vmem:[#allocation9 + $0x34] sm:$0xf0]  ;;  %v2242_v12 = vld [vmem:[#allocation9 + $0xb0] sm:$0xf]  ;;  %v2170_v16 = vld [vmem:[#allocation9 + $0x20] sm:$0xf] }
  0x52   :  { %721 = vmatpush.bf16.msrb.mxu1 %v2051_v28  ;;  %v2179_v13 = vor.u32 %v2487_v11, %v2178_v10  ;;  %v2503_v14 = vld [vmem:[#allocation9 + $0xb4] sm:$0xf0]  ;;  %v2485_v17 = vld [vmem:[#allocation9 + $0x24] sm:$0xf0]  ;;  %v2162_v22 = vld [vmem:[#allocation9 + $0x10] sm:$0xf] }
  0x53   :  { %750 = vmatpush.bf16.msrb.mxu2 %v1927_v18  ;;  %v2243_v15 = vor.u32 %v2503_v14, %v2242_v12  ;;  %v2234_v18 = vld [vmem:[#allocation9 + $0xa0] sm:$0xf]  ;;  %v2501_v20 = vld [vmem:[#allocation9 + $0xa4] sm:$0xf0]  ;;  %v2483_v23 = vld [vmem:[#allocation9 + $0x14] sm:$0xf0] }
  0x54   :  { %779 = vmatpush.bf16.msrb.mxu3 %v2055_v19  ;;  %v2171_v19 = vor.u32 %v2485_v17, %v2170_v16  ;;  %v2235_v21 = vor.u32 %v2501_v20, %v2234_v18  ;;  %v2226_v24 = vld [vmem:[#allocation9 + $0x90] sm:$0xf]  ;;  %v2163_v25 = vor.u32 %v2483_v23, %v2162_v22  ;;  %v2499_v26 = vld [vmem:[#allocation9 + $0x94] sm:$0xf0]  ;;  %v2154_v28 = vld [vmem:[#allocation9] sm:$0xf] }
  0x55   :  { %693 = vmatpush.bf16.msrb.mxu0 %v1907_v34  ;;  %v2227_v27 = vor.u32 %v2499_v26, %v2226_v24  ;;  %v2218_v30 = vld [vmem:[#allocation9 + $0x80] sm:$0xf]  ;;  %v2497_v32 = vld [vmem:[#allocation9 + $0x84] sm:$0xf0]  ;;  %v2872_v34 = vld [vmem:[#allocation8] sm:$0xf] }
  0x56   :  { %722 = vmatpush.bf16.msrb.mxu1 %v2035_v41  ;;  %v2875_v35 = vperm.slane %v2872_v34, 0  ;;  %v2338_v38 = vld [vmem:[#allocation9 + $0x170] sm:$0xf]  ;;  %v2527_v39 = vld [vmem:[#allocation9 + $0x174] sm:$0xf0]  ;;  %v2879_v45 = vperm.slane %v2872_v34, 1 }
  0x57   :  { %751 = vmatpush.bf16.msrb.mxu2 %v1911_v29  ;;  %v2481_v29 = vld [vmem:[#allocation9 + $0x4] sm:$0xf0]  ;;  %v2402_v40 = vld [vmem:[#allocation9 + $0x1f0] sm:$0xf]  ;;  %v2339_v41 = vor.u32 %v2527_v39, %v2338_v38  ;;  %v2330_v52 = vld [vmem:[#allocation9 + $0x160] sm:$0xf] }
  0x58   :  { %780 = vmatpush.bf16.msrb.mxu3 %v2039_v33  ;;  %588 = vmatmul.bf16.gmra.mxu0 %v1883_v42  ;;  %v2155_v31 = vor.u32 %v2481_v29, %v2154_v28  ;;  %v2219_v33 = vor.u32 %v2497_v32, %v2218_v30  ;;  %v2394_v54 = vld [vmem:[#allocation9 + $0x1e0] sm:$0xf]  ;;  %v2523_v6 = vld [vmem:[#allocation9 + $0x154] sm:$0xf0]  ;;  %v2386_v8 = vld [vmem:[#allocation9 + $0x1d0] sm:$0xf] }
  0x59   :  { %617 = vmatmul.bf16.gmra.mxu1 %v1887_v43  ;;  %1370 = vmatpush.bf16.msra.mxu0 %v2211_v53  ;;  %v2525_v53 = vld [vmem:[#allocation9 + $0x164] sm:$0xf0]  ;;  %v2314_v26 = vld [vmem:[#allocation9 + $0x140] sm:$0xf]  ;;  %v2212_v38 = vld [vmem:[#allocation9 + $0x78] sm:$0xf0] }
  0x5a   :  { %646 = vmatmul.bf16.gmra.mxu2 %v1883_v42  ;;  %1399 = vmatpush.bf16.msra.mxu1 %v2275_v55  ;;  %v2331_v55 = vor.u32 %v2525_v53, %v2330_v52  ;;  %v2378_v29 = vld [vmem:[#allocation9 + $0x1c0] sm:$0xf]  ;;  %v2537_v30 = vld [vmem:[#allocation9 + $0x1c4] sm:$0xf0]  ;;  %v2510_v39 = vld [vmem:[#allocation9 + $0xf4] sm:$0xf] }
  0x5b   :  { %675 = vmatmul.bf16.gmra.mxu3 %v1887_v43  ;;  %1428 = vmatpush.bf16.msra.mxu2 %v2339_v41  ;;  %v2276_v41 = vld [vmem:[#allocation9 + $0xf8] sm:$0xf0] }
  0x5e   :  { %1400 = vmatpush.bf16.msra.mxu1 %v2267_v59 }
  0x5f   :  { %1429 = vmatpush.bf16.msra.mxu2 %v2331_v55  ;;  %v2268_v55 = vld [vmem:[#allocation9 + $0xe8] sm:$0xf0] }
  0x68   :  { %593 = vmatmul.bf16.gmra.mxu0 %v2852_v48 }
  0x69   :  { %622 = vmatmul.bf16.gmra.mxu1 %v2854_v49 }
  0x6a   :  { %651 = vmatmul.bf16.gmra.mxu2 %v2852_v48 }
  0x6b   :  { %680 = vmatmul.bf16.gmra.mxu3 %v2854_v49 }
  0x78   :  { %694 = vmatmul.bf16.vlgmr.msrb.gmra.mxu0 %v2836_v2 }
  0x79   :  { %723 = vmatmul.bf16.vlgmr.msrb.gmra.mxu1 %v2838_v3 }
  0x7a   :  { %752 = vmatmul.bf16.vlgmr.msrb.gmra.mxu2 %v2836_v2  ;;  %v2493_v2 = vld [vmem:[#allocation9 + $0x64] sm:$0xf0] }
  0x7b   :  { %781 = vmatmul.bf16.vlgmr.msrb.gmra.mxu3 %v2838_v3  ;;  %v2203_v3 = vor.u32 %v2493_v2, %v2202_v56  ;;  %v2541_v56 = vld [vmem:[#allocation9 + $0x1e4] sm:$0xf0] }
  0x7d   :  { %1371 = vmatpush.bf16.msra.mxu0 %v2203_v3  ;;  %v2395_v3 = vor.u32 %v2541_v56, %v2394_v54 }
  0x81   :  { %1372 = vmatpush.bf16.msra.mxu0 %v2195_v63 }
  0x88   :  { %699 = vmatmul.bf16.gmra.mxu0 %v2844_v1 }
  0x89   :  { %728 = vmatmul.bf16.gmra.mxu1 %v2846_v4 }
  0x8a   :  { %757 = vmatmul.bf16.gmra.mxu2 %v2844_v1  ;;  %v2259_v1 = vor.u32 %v2507_v0, %v2258_v62 }
  0x8b   :  { %786 = vmatmul.bf16.gmra.mxu3 %v2846_v4  ;;  %v2186_v4 = vld [vmem:[#allocation9 + $0x40] sm:$0xf] }
  0x8c   :  { %1401 = vmatpush.bf16.msra.mxu1 %v2259_v1  ;;  %v2187_v7 = vor.u32 %v2489_v5, %v2186_v4  ;;  %v2322_v5 = vld [vmem:[#allocation9 + $0x150] sm:$0xf] }
  0x8e   :  { %1373 = vmatpush.bf16.msra.mxu0 %v2187_v7  ;;  %v2323_v7 = vor.u32 %v2523_v6, %v2322_v5  ;;  %v2506_v5 = vld [vmem:[#allocation9 + $0xd4] sm:$0xf]  ;;  %v2306_v6 = vld [vmem:[#allocation9 + $0x130] sm:$0xf] }
  0x90   :  { %1402 = vmatpush.bf16.msra.mxu1 %v2251_v9  ;;  %v2539_v9 = vld [vmem:[#allocation9 + $0x1d4] sm:$0xf0]  ;;  %1430 = vmatpush.bf16.msra.mxu2 %v2323_v7 }
  0x91   :  { %v2387_v11 = vor.u32 %v2539_v9, %v2386_v8  ;;  %v2519_v7 = vld [vmem:[#allocation9 + $0x134] sm:$0xf0]  ;;  %v2370_v8 = vld [vmem:[#allocation9 + $0x1b0] sm:$0xf] }
  0x92   :  { %1374 = vmatpush.bf16.msra.mxu0 %v2179_v13 }
  0x94   :  { %1403 = vmatpush.bf16.msra.mxu1 %v2243_v15 }
  0x96   :  { %1375 = vmatpush.bf16.msra.mxu0 %v2171_v19 }
  0x98   :  { %704 = vmatmul.bf16.gmra.mxu0 %v1883_v42  ;;  %1404 = vmatpush.bf16.msra.mxu1 %v2235_v21 }
  0x99   :  { %733 = vmatmul.bf16.gmra.mxu1 %v1887_v43 }
  0x9a   :  { %762 = vmatmul.bf16.gmra.mxu2 %v1883_v42  ;;  %1376 = vmatpush.bf16.msra.mxu0 %v2163_v25  ;;  %v2543_v42 = vld [vmem:[#allocation9 + $0x1f4] sm:$0xf0] }
  0x9b   :  { %791 = vmatmul.bf16.gmra.mxu3 %v1887_v43  ;;  %v2403_v44 = vor.u32 %v2543_v42, %v2402_v40 }
  0x9c   :  { %1405 = vmatpush.bf16.msra.mxu1 %v2227_v27  ;;  %v2521_v27 = vld [vmem:[#allocation9 + $0x144] sm:$0xf0] }
  0x9d   :  { %1457 = vmatpush.bf16.msra.mxu3 %v2403_v44  ;;  %v2315_v28 = vor.u32 %v2521_v27, %v2314_v26 }
  0x9e   :  { %1377 = vmatpush.bf16.msra.mxu0 %v2155_v31 }
  0x9f   :  { %1431 = vmatpush.bf16.msra.mxu2 %v2315_v28 }
  0xa0   :  { %1406 = vmatpush.bf16.msra.mxu1 %v2219_v33 }
  0xa1   :  { %1458 = vmatpush.bf16.msra.mxu3 %v2395_v3 }
  0xa5   :  { %1459 = vmatpush.bf16.msra.mxu3 %v2387_v11 }
  0xa8   :  { %709 = vmatmul.bf16.gmra.mxu0 %v2852_v48 }
  0xa9   :  { %738 = vmatmul.bf16.gmra.mxu1 %v2854_v49 }
  0xaa   :  { %767 = vmatmul.bf16.gmra.mxu2 %v2852_v48 }
  0xab   :  { %796 = vmatmul.bf16.gmra.mxu3 %v2854_v49 }
  0xb5   :  { %v579_v36 = vpop.f32.mrf.mxu0 }
  0xb6   :  { %v608_v37 = vpop.f32.mrf.mxu1  ;;  %v580_v43 = vadd.f32 %v579_v36, %v2875_v35  ;;  %v2379_v36 = vor.u32 %v2537_v30, %v2378_v29  ;;  %v2504_v30 = vld [vmem:[#allocation9 + $0xc4] sm:$0xf] }
  0xb8   :  { %v2881_v46 = vadd.f32 %v608_v37, %v580_v43  ;;  %v2494_v37 = vld [vmem:[#allocation9 + $0x74] sm:$0xf]  ;;  %1460 = vmatpush.bf16.msra.mxu3 %v2379_v36  ;;  %v2252_v36 = vld [vmem:[#allocation9 + $0xc8] sm:$0xf0] }
  0xb9   :  { %v2215_v40 = vor.u32 %v2494_v37, %v2212_v38 }
  0xba   :  { %v802_v2 = vmax.f32 %v2881_v46, 0.0 }
  0xbb   :  { %1486 = vmatpush.bf16.msrb.mxu0 %v2215_v40 }
  0xbd   :  { %v637_v47 = vpop.f32.mrf.mxu2  ;;  %v581_v50 = vpop.f32.mrf.mxu0 }
  0xbe   :  { %v666_v48 = vpop.f32.mrf.mxu3  ;;  %v638_v49 = vadd.f32 %v637_v47, %v2879_v45  ;;  %v610_v51 = vpop.f32.mrf.mxu1  ;;  %v582_v59 = vadd.f32 %v581_v50, %v2875_v35  ;;  %v2279_v47 = vor.u32 %v2510_v39, %v2276_v41  ;;  %v2204_v50 = vld [vmem:[#allocation9 + $0x68] sm:$0xf0] }
  0xc0   :  { %v2885_v57 = vadd.f32 %v666_v48, %v638_v49  ;;  %v2893_v63 = vadd.f32 %v610_v51, %v582_v59  ;;  %1515 = vmatpush.bf16.msrb.mxu1 %v2279_v47  ;;  %v2492_v49 = vld [vmem:[#allocation9 + $0x64] sm:$0xf] }
  0xc1   :  { %v2508_v51 = vld [vmem:[#allocation9 + $0xe4] sm:$0xf]  ;;  %v2207_v54 = vor.u32 %v2492_v49, %v2204_v50 }
  0xc2   :  { %v803_v58 = vmax.f32 %v2885_v57, 0.0  ;;  %v806_v12 = vmax.f32 %v2893_v63, 0.0  ;;  %v2228_v63 = vld [vmem:[#allocation9 + $0x98] sm:$0xf0] }
  0xc3   :  { %1487 = vmatpush.bf16.msrb.mxu0 %v2207_v54 }
  0xc4   :  { %v834_v60 = vpack.c.bf16 %v803_v58, %v802_v2 }
  0xc5   :  { %v639_v61 = vpop.f32.mrf.mxu2  ;;  %v584_v1 = vpop.f32.mrf.mxu0 }
  0xc6   :  { %v668_v62 = vpop.f32.mrf.mxu3  ;;  %850 = vst [vmem:[#allocation12] sm:$0xff] %v834_v60  ;;  %v640_v0 = vadd.f32 %v639_v61, %v2879_v45  ;;  %v613_v4 = vpop.f32.mrf.mxu1  ;;  %v585_v14 = vadd.f32 %v584_v1, %v2875_v35  ;;  %v986_v16 = vunpack.c.l.b16 %v834_v60  ;;  %v987_v17 = vunpack.c.h.b16 %v834_v60  ;;  %v2490_v1 = vld [vmem:[#allocation9 + $0x54] sm:$0xf] }
  0xc8   :  { %v2896_v10 = vadd.f32 %v668_v62, %v640_v0  ;;  %v2905_v22 = vadd.f32 %v613_v4, %v585_v14  ;;  %v2271_v62 = vor.u32 %v2508_v51, %v2268_v55  ;;  %v2196_v4 = vld [vmem:[#allocation9 + $0x58] sm:$0xf0]  ;;  %v2298_v51 = vld [vmem:[#allocation9 + $0x120] sm:$0xf]  ;;  %v2533_v55 = vld [vmem:[#allocation9 + $0x1a4] sm:$0xf0] }
  0xc9   :  { %v2199_v9 = vor.u32 %v2490_v1, %v2196_v4  ;;  %v2502_v4 = vld [vmem:[#allocation9 + $0xb4] sm:$0xf] }
  0xca   :  { %v807_v13 = vmax.f32 %v2896_v10, 0.0  ;;  %v810_v42 = vmax.f32 %v2905_v22, 0.0  ;;  %1516 = vmatpush.bf16.msrb.mxu1 %v2271_v62  ;;  %v2513_v22 = vld [vmem:[#allocation9 + $0x104] sm:$0xf0]  ;;  %v2993_v10 = vperm.slane %v2872_v34, 2 }
  0xcb   :  { %1488 = vmatpush.bf16.msrb.mxu0 %v2199_v9  ;;  %v2172_v9 = vld [vmem:[#allocation9 + $0x28] sm:$0xf0] }
  0xcc   :  { %v836_v15 = vpack.c.bf16 %v807_v13, %v806_v12 }
  0xcd   :  { %v642_v18 = vpop.f32.mrf.mxu2  ;;  %v586_v24 = vpop.f32.mrf.mxu0 }
  0xce   :  { %v671_v19 = vpop.f32.mrf.mxu3  ;;  %852 = vst [vmem:[#allocation12 + $0x10] sm:$0xff] %v836_v15  ;;  %v990_v20 = vunpack.c.l.b16 %v836_v15  ;;  %v991_v21 = vunpack.c.h.b16 %v836_v15  ;;  %v643_v23 = vadd.f32 %v642_v18, %v2879_v45  ;;  %v615_v25 = vpop.f32.mrf.mxu1  ;;  %v587_v44 = vadd.f32 %v586_v24, %v2875_v35  ;;  %v2188_v24 = vld [vmem:[#allocation9 + $0x48] sm:$0xf0] }
  0xcf   :  { %v2307_v15 = vor.u32 %v2519_v7, %v2306_v6 }
  0xd0   :  { %v2908_v31 = vadd.f32 %v671_v19, %v643_v23  ;;  %v2910_v32 = vpack.c.b16 %v990_v20, %v986_v16  ;;  %v2912_v33 = vpack.c.b16 %v991_v21, %v987_v17  ;;  %v2923_v56 = vadd.f32 %v615_v25, %v587_v44  ;;  %v2535_v16 = vld [vmem:[#allocation9 + $0x1b4] sm:$0xf0]  ;;  %v2260_v17 = vld [vmem:[#allocation9 + $0xd8] sm:$0xf0]  ;;  %v2488_v23 = vld [vmem:[#allocation9 + $0x44] sm:$0xf] }
  0xd1   :  { %v2371_v19 = vor.u32 %v2535_v16, %v2370_v8  ;;  %v2263_v20 = vor.u32 %v2506_v5, %v2260_v17  ;;  %1432 = vmatpush.bf16.msra.mxu2 %v2307_v15  ;;  %v2191_v29 = vor.u32 %v2488_v23, %v2188_v24  ;;  %v2255_v44 = vor.u32 %v2504_v30, %v2252_v36  ;;  %v2244_v5 = vld [vmem:[#allocation9 + $0xb8] sm:$0xf0]  ;;  %v2484_v8 = vld [vmem:[#allocation9 + $0x24] sm:$0xf] }
  0xd2   :  { %v811_v43 = vmax.f32 %v2908_v31, 0.0  ;;  %1378 = vmatmul.bf16.vlgmr.msra.gmra.mxu0 %v2910_v32  ;;  %1407 = vmatmul.bf16.vlgmr.msra.gmra.mxu1 %v2912_v33  ;;  %v814_v11 = vmax.f32 %v2923_v56, 0.0  ;;  %v2247_v6 = vor.u32 %v2502_v4, %v2244_v5  ;;  %v2500_v15 = vld [vmem:[#allocation9 + $0xa4] sm:$0xf]  ;;  %v2529_v56 = vld [vmem:[#allocation9 + $0x184] sm:$0xf0] }
  0xd3   :  { %1461 = vmatpush.bf16.msra.mxu3 %v2371_v19  ;;  %1517 = vmatpush.bf16.msrb.mxu1 %v2263_v20  ;;  %v2175_v19 = vor.u32 %v2484_v8, %v2172_v9  ;;  %v2236_v20 = vld [vmem:[#allocation9 + $0xa8] sm:$0xf0] }
  0xd4   :  { %v838_v48 = vpack.c.bf16 %v811_v43, %v810_v42  ;;  %1489 = vmatpush.bf16.msrb.mxu0 %v2191_v29  ;;  %v870_v29 = vadd.f32 %v806_v12, %v802_v2  ;;  %v2156_v8 = vld [vmem:[#allocation9 + $0x8] sm:$0xf0] }
  0xd5   :  { %v644_v52 = vpop.f32.mrf.mxu2  ;;  %v589_v59 = vpop.f32.mrf.mxu0 }
  0xd6   :  { %v673_v53 = vpop.f32.mrf.mxu3  ;;  %854 = vst [vmem:[#allocation12 + $0x20] sm:$0xff] %v838_v48  ;;  %v645_v3 = vadd.f32 %v644_v52, %v2879_v45  ;;  %v618_v60 = vpop.f32.mrf.mxu1  ;;  %v590_v61 = vadd.f32 %v589_v59, %v2875_v35  ;;  %v994_v27 = vunpack.c.l.b16 %v838_v48  ;;  %v995_v28 = vunpack.c.h.b16 %v838_v48  ;;  %v2517_v52 = vld [vmem:[#allocation9 + $0x124] sm:$0xf0]  ;;  %v2180_v59 = vld [vmem:[#allocation9 + $0x38] sm:$0xf0] }
  0xd7   :  { %v2299_v54 = vor.u32 %v2517_v52, %v2298_v51  ;;  %1518 = vmatpush.bf16.msrb.mxu1 %v2255_v44  ;;  %v2164_v44 = vld [vmem:[#allocation9 + $0x18] sm:$0xf0]  ;;  %v2498_v51 = vld [vmem:[#allocation9 + $0x94] sm:$0xf]  ;;  %v871_v52 = vadd.f32 %v870_v29, %v810_v42  ;;  %v2346_v42 = vld [vmem:[#allocation9 + $0x180] sm:$0xf] }
  0xd8   :  { %v2927_v0 = vadd.f32 %v673_v53, %v645_v3  ;;  %v2931_v18 = vadd.f32 %v618_v60, %v590_v61  ;;  %v2362_v53 = vld [vmem:[#allocation9 + $0x1a0] sm:$0xf]  ;;  %v2486_v3 = vld [vmem:[#allocation9 + $0x34] sm:$0xf] }
  0xd9   :  { %v2363_v62 = vor.u32 %v2533_v55, %v2362_v53  ;;  %v2183_v1 = vor.u32 %v2486_v3, %v2180_v59  ;;  %1433 = vmatpush.bf16.msra.mxu2 %v2299_v54  ;;  %v2231_v53 = vor.u32 %v2498_v51, %v2228_v63  ;;  %v872_v54 = vadd.f32 %v871_v52, %v814_v11  ;;  %v2282_v59 = vld [vmem:[#allocation9 + $0x100] sm:$0xf]  ;;  %v2526_v52 = vld [vmem:[#allocation9 + $0x174] sm:$0xf] }
  0xda   :  { %v815_v14 = vmax.f32 %v2927_v0, 0.0  ;;  %v818_v47 = vmax.f32 %v2931_v18, 0.0  ;;  %v2347_v18 = vor.u32 %v2529_v56, %v2346_v42  ;;  %v2404_v0 = vld [vmem:[#allocation9 + $0x1f8] sm:$0xf0]  ;;  %v2524_v56 = vld [vmem:[#allocation9 + $0x164] sm:$0xf] }
  0xdb   :  { %1462 = vmatpush.bf16.msra.mxu3 %v2363_v62  ;;  %1490 = vmatpush.bf16.msrb.mxu0 %v2183_v1 }
  0xdc   :  { %v840_v21 = vpack.c.bf16 %v815_v14, %v814_v11  ;;  %1519 = vmatpush.bf16.msrb.mxu1 %v2247_v6  ;;  %v2283_v6 = vor.u32 %v2513_v22, %v2282_v59  ;;  %v2480_v11 = vld [vmem:[#allocation9 + $0x4] sm:$0xf] }
  0xdd   :  { %v647_v25 = vpop.f32.mrf.mxu2  ;;  %v591_v38 = vpop.f32.mrf.mxu0 }
  0xde   :  { %v676_v26 = vpop.f32.mrf.mxu3  ;;  %856 = vst [vmem:[#allocation12 + $0x30] sm:$0xff] %v840_v21  ;;  %v648_v37 = vadd.f32 %v647_v25, %v2879_v45  ;;  %v620_v39 = vpop.f32.mrf.mxu1  ;;  %v998_v40 = vunpack.c.l.b16 %v840_v21  ;;  %v999_v41 = vunpack.c.h.b16 %v840_v21  ;;  %v592_v61 = vadd.f32 %v591_v38, %v2875_v35  ;;  %v2531_v38 = vld [vmem:[#allocation9 + $0x194] sm:$0xf0] }
  0xdf   :  { %1491 = vmatpush.bf16.msrb.mxu0 %v2175_v19 }
  0xe0   :  { %v2939_v49 = vadd.f32 %v676_v26, %v648_v37  ;;  %v2941_v50 = vpack.c.b16 %v998_v40, %v994_v27  ;;  %v2943_v48 = vpack.c.b16 %v999_v41, %v995_v28  ;;  %v2956_v21 = vadd.f32 %v620_v39, %v592_v61  ;;  %v2290_v26 = vld [vmem:[#allocation9 + $0x110] sm:$0xf]  ;;  %v2515_v27 = vld [vmem:[#allocation9 + $0x114] sm:$0xf0]  ;;  %v2482_v41 = vld [vmem:[#allocation9 + $0x14] sm:$0xf] }
  0xe1   :  { %v2239_v28 = vor.u32 %v2500_v15, %v2236_v20  ;;  %v2291_v36 = vor.u32 %v2515_v27, %v2290_v26  ;;  %v2354_v37 = vld [vmem:[#allocation9 + $0x190] sm:$0xf]  ;;  %v2167_v46 = vor.u32 %v2482_v41, %v2164_v44  ;;  %v873_v61 = vadd.f32 %v872_v54, %v818_v47  ;;  %v2220_v20 = vld [vmem:[#allocation9 + $0x88] sm:$0xf0] }
  0xe2   :  { %v819_v60 = vmax.f32 %v2939_v49, 0.0  ;;  %1383 = vmatmul.bf16.gmra.mxu0 %v2941_v50  ;;  %1412 = vmatmul.bf16.gmra.mxu1 %v2943_v48  ;;  %v2355_v39 = vor.u32 %v2531_v38, %v2354_v37  ;;  %v822_v2 = vmax.f32 %v2956_v21, 0.0 }
  0xe3   :  { %1434 = vmatpush.bf16.msra.mxu2 %v2291_v36  ;;  %1520 = vmatpush.bf16.msrb.mxu1 %v2239_v28 }
  0xe4   :  { %v2953_v7 = vpack.c.bf16 %v819_v60, %v818_v47  ;;  %1463 = vmatpush.bf16.msra.mxu3 %v2355_v39  ;;  %1492 = vmatpush.bf16.msrb.mxu0 %v2167_v46  ;;  %v2496_v47 = vld [vmem:[#allocation9 + $0x84] sm:$0xf]  ;;  %v874_v29 = vadd.f32 %v873_v61, %v822_v2  ;;  %v2340_v46 = vld [vmem:[#allocation9 + $0x178] sm:$0xf0] }
  0xe5   :  { %v649_v16 = vpop.f32.mrf.mxu2  ;;  %v594_v24 = vpop.f32.mrf.mxu0 }
  0xe6   :  { %v678_v17 = vpop.f32.mrf.mxu3  ;;  %858 = vst [vmem:[#allocation12 + $0x40] sm:$0xff] %v2953_v7  ;;  %v650_v23 = vadd.f32 %v649_v16, %v2879_v45  ;;  %v623_v25 = vpop.f32.mrf.mxu1  ;;  %v595_v30 = vadd.f32 %v594_v24, %v2875_v35  ;;  %v1002_v4 = vunpack.c.l.b16 %v2953_v7  ;;  %v1003_v5 = vunpack.c.h.b16 %v2953_v7 }
  0xe7   :  { %1521 = vmatpush.bf16.msrb.mxu1 %v2231_v53  ;;  %1435 = vmatpush.bf16.msra.mxu2 %v2283_v6  ;;  %v2159_v7 = vor.u32 %v2480_v11, %v2156_v8  ;;  %v2223_v24 = vor.u32 %v2496_v47, %v2220_v20  ;;  %v2542_v53 = vld [vmem:[#allocation9 + $0x1f4] sm:$0xf]  ;;  %v2332_v11 = vld [vmem:[#allocation9 + $0x168] sm:$0xf0] }
  0xe8   :  { %v2964_v40 = vadd.f32 %v678_v17, %v650_v23  ;;  %v624_v55 = vadd.f32 %v623_v25, %v595_v30  ;;  %v877_v25 = vadd.f32 %v807_v13, %v803_v58  ;;  %1464 = vmatpush.bf16.msra.mxu3 %v2347_v18  ;;  %v2335_v8 = vor.u32 %v2524_v56, %v2332_v11 }
  0xe9   :  { %1493 = vmatpush.bf16.msrb.mxu0 %v2159_v7 }
  0xea   :  { %v823_v12 = vmax.f32 %v2964_v40, 0.0  ;;  %v826_v21 = vmax.f32 %v624_v55, 0.0  ;;  %v2407_v55 = vor.u32 %v2542_v53, %v2404_v0 }
  0xeb   :  { %1522 = vmatpush.bf16.msrb.mxu1 %v2223_v24 }
  0xec   :  { %v844_v3 = vpack.c.bf16 %v823_v12, %v822_v2  ;;  %v875_v57 = vadd.f32 %v874_v29, %v826_v21  ;;  %v2343_v2 = vor.u32 %v2526_v52, %v2340_v46  ;;  %1573 = vmatpush.bf16.msrb.mxu3 %v2407_v55  ;;  %v2316_v55 = vld [vmem:[#allocation9 + $0x148] sm:$0xf0] }
  0xed   :  { %v652_v62 = vpop.f32.mrf.mxu2  ;;  %v596_v15 = vpop.f32.mrf.mxu0 }
  0xee   :  { %v681_v1 = vpop.f32.mrf.mxu3  ;;  %860 = vst [vmem:[#allocation12 + $0x50] sm:$0xff] %v844_v3  ;;  %v653_v9 = vadd.f32 %v652_v62, %v2879_v45  ;;  %v625_v16 = vpop.f32.mrf.mxu1  ;;  %v1006_v17 = vunpack.c.l.b16 %v844_v3  ;;  %v1007_v19 = vunpack.c.h.b16 %v844_v3  ;;  %v597_v23 = vadd.f32 %v596_v15, %v2875_v35  ;;  %1544 = vmatpush.bf16.msrb.mxu2 %v2343_v2  ;;  %v2396_v15 = vld [vmem:[#allocation9 + $0x1e8] sm:$0xf0] }
  0xef   :  { %v878_v35 = vadd.f32 %v877_v25, %v811_v43 }
  0xf0   :  { %v682_v26 = vadd.f32 %v681_v1, %v653_v9  ;;  %v2984_v27 = vpack.c.b16 %v1006_v17, %v1002_v4  ;;  %v2986_v28 = vpack.c.b16 %v1007_v19, %v1003_v5  ;;  %v626_v30 = vadd.f32 %v625_v16, %v597_v23  ;;  %v2540_v9 = vld [vmem:[#allocation9 + $0x1e4] sm:$0xf] }
  0xf1   :  { %v879_v13 = vadd.f32 %v878_v35, %v815_v14  ;;  %v2399_v18 = vor.u32 %v2540_v9, %v2396_v15  ;;  %v2324_v35 = vld [vmem:[#allocation9 + $0x158] sm:$0xf0] }
  0xf2   :  { %v827_v36 = vmax.f32 %v682_v26, 0.0  ;;  %1388 = vmatmul.bf16.gmra.mxu0 %v2984_v27  ;;  %1417 = vmatmul.bf16.gmra.mxu1 %v2986_v28  ;;  %v830_v58 = vmax.f32 %v626_v30, 0.0  ;;  %v2522_v30 = vld [vmem:[#allocation9 + $0x154] sm:$0xf] }
  0xf3   :  { %v880_v31 = vadd.f32 %v879_v13, %v819_v60  ;;  %1545 = vmatpush.bf16.msrb.mxu2 %v2335_v8  ;;  %1574 = vmatpush.bf16.msrb.mxu3 %v2399_v18  ;;  %v2308_v18 = vld [vmem:[#allocation9 + $0x138] sm:$0xf0] }
  0xf4   :  { %v846_v37 = vpack.c.bf16 %v827_v36, %v826_v21  ;;  %v876_v38 = vadd.f32 %v875_v57, %v830_v58  ;;  %v2538_v57 = vld [vmem:[#allocation9 + $0x1d4] sm:$0xf] }
  0xf5   :  { %v654_v39 = vpop.f32.mrf.mxu2  ;;  %v695_v44 = vpop.f32.mrf.mxu0  ;;  %v881_v14 = vadd.f32 %v880_v31, %v823_v12 }
  0xf6   :  { %v683_v41 = vpop.f32.mrf.mxu3  ;;  %862 = vst [vmem:[#allocation12 + $0x60] sm:$0xff] %v846_v37  ;;  %v655_v43 = vadd.f32 %v654_v39, %v2879_v45  ;;  %v724_v51 = vpop.f32.mrf.mxu1  ;;  %v696_v63 = vadd.f32 %v695_v44, %v2993_v10  ;;  %v3004_v45 = vperm.slane %v2872_v34, 3  ;;  %v1010_v62 = vunpack.c.l.b16 %v846_v37 }
  0xf7   :  { %902 = vst [vmem:[#allocation15] sm:$0xff] %v876_v38  ;;  %v882_v49 = vadd.f32 %v881_v14, %v827_v36  ;;  %v1011_v1 = vunpack.c.h.b16 %v846_v37  ;;  %v2327_v36 = vor.u32 %v2522_v30, %v2324_v35 }
  0xf8   :  { %v684_v54 = vadd.f32 %v683_v41, %v655_v43  ;;  %v3006_v3 = vadd.f32 %v724_v51, %v696_v63 }
  0xf9   :  { %1546 = vmatpush.bf16.msrb.mxu2 %v2327_v36 }
  0xfa   :  { %v831_v60 = vmax.f32 %v684_v54, 0.0  ;;  %v804_v34 = vmax.f32 %v3006_v3, 0.0  ;;  %v2520_v54 = vld [vmem:[#allocation9 + $0x144] sm:$0xf] }
  0xfc   :  { %v848_v59 = vpack.c.bf16 %v831_v60, %v830_v58  ;;  %v883_v22 = vadd.f32 %v882_v49, %v831_v60  ;;  %v2388_v58 = vld [vmem:[#allocation9 + $0x1d8] sm:$0xf0]  ;;  %v2319_v49 = vor.u32 %v2520_v54, %v2316_v55  ;;  %v2536_v60 = vld [vmem:[#allocation9 + $0x1c4] sm:$0xf]  ;;  %v2364_v54 = vld [vmem:[#allocation9 + $0x1a8] sm:$0xf0] }
  0xfd   :  { %v753_v42 = vpop.f32.mrf.mxu2  ;;  %v697_v12 = vpop.f32.mrf.mxu0  ;;  %v2391_v37 = vor.u32 %v2538_v57, %v2388_v58 }
  0xfe   :  { %v782_v61 = vpop.f32.mrf.mxu3  ;;  %864 = vst [vmem:[#allocation12 + $0x70] sm:$0xff] %v848_v59  ;;  %v754_v40 = vadd.f32 %v753_v42, %v3004_v45  ;;  %v726_v4 = vpop.f32.mrf.mxu1  ;;  %v1014_v5 = vunpack.c.l.b16 %v848_v59  ;;  %v1015_v6 = vunpack.c.h.b16 %v848_v59  ;;  %v698_v20 = vadd.f32 %v697_v12, %v2993_v10  ;;  %v2380_v59 = vld [vmem:[#allocation9 + $0x1c8] sm:$0xf0]  ;;  %1547 = vmatpush.bf16.msrb.mxu2 %v2319_v49 }
  0xff   :  { %903 = vst [vmem:[#allocation15 + $0x8] sm:$0xff] %v883_v22  ;;  %1575 = vmatpush.bf16.msrb.mxu3 %v2391_v37 }
 0x100   :  { %v3010_v16 = vadd.f32 %v782_v61, %v754_v40  ;;  %v3012_v17 = vpack.c.b16 %v1014_v5, %v1010_v62  ;;  %v3014_v19 = vpack.c.b16 %v1015_v6, %v1011_v1  ;;  %v3024_v24 = vadd.f32 %v726_v4, %v698_v20 }
 0x101   :  { %v2383_v62 = vor.u32 %v2536_v60, %v2380_v59 }
 0x102   :  { %v805_v47 = vmax.f32 %v3010_v16, 0.0  ;;  %1393 = vmatmul.bf16.gmra.mxu0 %v3012_v17  ;;  %1422 = vmatmul.bf16.gmra.mxu1 %v3014_v19  ;;  %v808_v38 = vmax.f32 %v3024_v24, 0.0 }
 0x103   :  { %1576 = vmatpush.bf16.msrb.mxu3 %v2383_v62  ;;  %v2514_v62 = vld [vmem:[#allocation9 + $0x114] sm:$0xf] }
 0x104   :  { %v835_v21 = vpack.c.bf16 %v805_v47, %v804_v34 }
 0x105   :  { %v755_v23 = vpop.f32.mrf.mxu2  ;;  %v700_v26 = vpop.f32.mrf.mxu0 }
 0x106   :  { %v784_v7 = vpop.f32.mrf.mxu3  ;;  %851 = vst [vmem:[#allocation12 + $0x8] sm:$0xff] %v835_v21  ;;  %v756_v25 = vadd.f32 %v755_v23, %v3004_v45  ;;  %v729_v29 = vpop.f32.mrf.mxu1  ;;  %v701_v41 = vadd.f32 %v700_v26, %v2993_v10  ;;  %v988_v43 = vunpack.c.l.b16 %v835_v21  ;;  %v989_v44 = vunpack.c.h.b16 %v835_v21 }
 0x108   :  { %v3027_v13 = vadd.f32 %v784_v7, %v756_v25  ;;  %v3036_v2 = vadd.f32 %v729_v29, %v701_v41  ;;  %v2372_v25 = vld [vmem:[#allocation9 + $0x1b8] sm:$0xf0] }
 0x10a   :  { %v809_v39 = vmax.f32 %v3027_v13, 0.0  ;;  %v812_v1 = vmax.f32 %v3036_v2, 0.0 }
 0x10c   :  { %v837_v31 = vpack.c.bf16 %v809_v39, %v808_v38 }
 0x10d   :  { %v758_v51 = vpop.f32.mrf.mxu2  ;;  %v702_v0 = vpop.f32.mrf.mxu0 }
 0x10e   :  { %v787_v52 = vpop.f32.mrf.mxu3  ;;  %853 = vst [vmem:[#allocation12 + $0x18] sm:$0xff] %v837_v31  ;;  %v992_v46 = vunpack.c.l.b16 %v837_v31  ;;  %v993_v63 = vunpack.c.h.b16 %v837_v31  ;;  %v759_v53 = vadd.f32 %v758_v51, %v3004_v45  ;;  %v731_v14 = vpop.f32.mrf.mxu1  ;;  %v703_v12 = vadd.f32 %v702_v0, %v2993_v10  ;;  %v2532_v0 = vld [vmem:[#allocation9 + $0x1a4] sm:$0xf] }
 0x10f   :  { %v2367_v59 = vor.u32 %v2532_v0, %v2364_v54 }
 0x110   :  { %v3039_v22 = vadd.f32 %v787_v52, %v759_v53  ;;  %v3041_v42 = vpack.c.b16 %v992_v46, %v988_v43  ;;  %v3043_v61 = vpack.c.b16 %v993_v63, %v989_v44  ;;  %v3056_v56 = vadd.f32 %v731_v14, %v703_v12  ;;  %v2516_v63 = vld [vmem:[#allocation9 + $0x124] sm:$0xf]  ;;  %v2300_v53 = vld [vmem:[#allocation9 + $0x128] sm:$0xf0]  ;;  %v2292_v12 = vld [vmem:[#allocation9 + $0x118] sm:$0xf0] }
 0x111   :  { %v2303_v14 = vor.u32 %v2516_v63, %v2300_v53 }
 0x112   :  { %v813_v40 = vmax.f32 %v3039_v22, 0.0  ;;  %1436 = vmatmul.bf16.vlgmr.msra.gmra.mxu2 %v3041_v42  ;;  %1465 = vmatmul.bf16.vlgmr.msra.gmra.mxu3 %v3043_v61  ;;  %v816_v20 = vmax.f32 %v3056_v56, 0.0  ;;  %v891_v56 = vadd.f32 %v809_v39, %v805_v47 }
 0x113   :  { %1494 = vmatmul.bf16.vlgmr.msrb.gmra.mxu0 %v2910_v32  ;;  %1523 = vmatmul.bf16.vlgmr.msrb.gmra.mxu1 %v2912_v33  ;;  %v2518_v32 = vld [vmem:[#allocation9 + $0x134] sm:$0xf] }
 0x114   :  { %v839_v4 = vpack.c.bf16 %v813_v40, %v812_v1  ;;  %v2534_v33 = vld [vmem:[#allocation9 + $0x1b4] sm:$0xf]  ;;  %v2311_v7 = vor.u32 %v2518_v32, %v2308_v18 }
 0x115   :  { %v760_v5 = vpop.f32.mrf.mxu2  ;;  %v705_v8 = vpop.f32.mrf.mxu0  ;;  %v2375_v26 = vor.u32 %v2534_v33, %v2372_v25  ;;  %v2284_v33 = vld [vmem:[#allocation9 + $0x108] sm:$0xf0] }
 0x116   :  { %v789_v6 = vpop.f32.mrf.mxu3  ;;  %855 = vst [vmem:[#allocation12 + $0x28] sm:$0xff] %v839_v4  ;;  %v761_v11 = vadd.f32 %v760_v5, %v3004_v45  ;;  %v734_v9 = vpop.f32.mrf.mxu1  ;;  %v706_v23 = vadd.f32 %v705_v8, %v2993_v10  ;;  %1548 = vmatpush.bf16.msrb.mxu2 %v2311_v7  ;;  %v996_v36 = vunpack.c.l.b16 %v839_v4  ;;  %v997_v57 = vunpack.c.h.b16 %v839_v4  ;;  %v2512_v8 = vld [vmem:[#allocation9 + $0x104] sm:$0xf]  ;;  %v2348_v7 = vld [vmem:[#allocation9 + $0x188] sm:$0xf0] }
 0x117   :  { %1577 = vmatpush.bf16.msrb.mxu3 %v2375_v26  ;;  %v2295_v5 = vor.u32 %v2514_v62, %v2292_v12 }
 0x118   :  { %v3059_v15 = vadd.f32 %v789_v6, %v761_v11  ;;  %v3068_v58 = vadd.f32 %v734_v9, %v706_v23  ;;  %v2530_v6 = vld [vmem:[#allocation9 + $0x194] sm:$0xf]  ;;  %v2356_v11 = vld [vmem:[#allocation9 + $0x198] sm:$0xf0]  ;;  %v2528_v23 = vld [vmem:[#allocation9 + $0x184] sm:$0xf] }
 0x119   :  { %v2359_v18 = vor.u32 %v2530_v6, %v2356_v11  ;;  %v892_v6 = vadd.f32 %v891_v56, %v813_v40 }
 0x11a   :  { %v817_v21 = vmax.f32 %v3059_v15, 0.0  ;;  %v820_v55 = vmax.f32 %v3068_v58, 0.0  ;;  %1549 = vmatpush.bf16.msrb.mxu2 %v2303_v14 }
 0x11b   :  { %1578 = vmatpush.bf16.msrb.mxu3 %v2367_v59 }
 0x11c   :  { %v841_v29 = vpack.c.bf16 %v817_v21, %v816_v20 }
 0x11d   :  { %v763_v30 = vpop.f32.mrf.mxu2  ;;  %v707_v41 = vpop.f32.mrf.mxu0 }
 0x11e   :  { %v792_v35 = vpop.f32.mrf.mxu3  ;;  %857 = vst [vmem:[#allocation12 + $0x38] sm:$0xff] %v841_v29  ;;  %v764_v37 = vadd.f32 %v763_v30, %v3004_v45  ;;  %v736_v31 = vpop.f32.mrf.mxu1  ;;  %v1000_v43 = vunpack.c.l.b16 %v841_v29  ;;  %v1001_v44 = vunpack.c.h.b16 %v841_v29  ;;  %v708_v60 = vadd.f32 %v707_v41, %v2993_v10  ;;  %1550 = vmatpush.bf16.msrb.mxu2 %v2295_v5 }
 0x11f   :  { %1579 = vmatpush.bf16.msrb.mxu3 %v2359_v18 }
 0x120   :  { %v3071_v51 = vadd.f32 %v792_v35, %v764_v37  ;;  %v3073_v52 = vpack.c.b16 %v1000_v43, %v996_v36  ;;  %v3075_v46 = vpack.c.b16 %v1001_v44, %v997_v57  ;;  %v2287_v35 = vor.u32 %v2512_v8, %v2284_v33 }
 0x121   :  { %v2351_v36 = vor.u32 %v2528_v23, %v2348_v7  ;;  %v884_v57 = vadd.f32 %v808_v38, %v804_v34 }
 0x122   :  { %v821_v49 = vmax.f32 %v3071_v51, 0.0  ;;  %1441 = vmatmul.bf16.gmra.mxu2 %v3073_v52  ;;  %1470 = vmatmul.bf16.gmra.mxu3 %v3075_v46 }
 0x123   :  { %1499 = vmatmul.bf16.gmra.mxu0 %v2941_v50  ;;  %1528 = vmatmul.bf16.gmra.mxu1 %v2943_v48  ;;  %v737_v50 = vadd.f32 %v736_v31, %v708_v60  ;;  %v885_v41 = vadd.f32 %v884_v57, %v812_v1 }
 0x124   :  { %v843_v4 = vpack.c.bf16 %v821_v49, %v820_v55  ;;  %1551 = vmatpush.bf16.msrb.mxu2 %v2287_v35  ;;  %1580 = vmatpush.bf16.msrb.mxu3 %v2351_v36 }
 0x125   :  { %v765_v9 = vpop.f32.mrf.mxu2  ;;  %v710_v25 = vpop.f32.mrf.mxu0  ;;  %v824_v58 = vmax.f32 %v737_v50, 0.0  ;;  %v886_v44 = vadd.f32 %v885_v41, %v816_v20 }
 0x126   :  { %v794_v32 = vpop.f32.mrf.mxu3  ;;  %859 = vst [vmem:[#allocation12 + $0x48] sm:$0xff] %v843_v4  ;;  %v766_v48 = vadd.f32 %v765_v9, %v3004_v45  ;;  %v739_v26 = vpop.f32.mrf.mxu1  ;;  %v711_v29 = vadd.f32 %v710_v25, %v2993_v10  ;;  %v1004_v0 = vunpack.c.l.b16 %v843_v4  ;;  %v1005_v38 = vunpack.c.h.b16 %v843_v4 }
 0x127   :  { %v887_v54 = vadd.f32 %v886_v44, %v820_v55 }
 0x128   :  { %v795_v30 = vadd.f32 %v794_v32, %v766_v48  ;;  %v740_v31 = vadd.f32 %v739_v26, %v711_v29 }
 0x129   :  { %v888_v12 = vadd.f32 %v887_v54, %v824_v58 }
 0x12a   :  { %v825_v37 = vmax.f32 %v795_v30, 0.0  ;;  %v828_v2 = vmax.f32 %v740_v31, 0.0 }
 0x12c   :  { %v845_v43 = vpack.c.bf16 %v825_v37, %v824_v58  ;;  %v889_v55 = vadd.f32 %v888_v12, %v828_v2 }
 0x12d   :  { %v768_v63 = vpop.f32.mrf.mxu2  ;;  %v712_v24 = vpop.f32.mrf.mxu0 }
 0x12e   :  { %v797_v53 = vpop.f32.mrf.mxu3  ;;  %861 = vst [vmem:[#allocation12 + $0x58] sm:$0xff] %v845_v43  ;;  %v769_v3 = vadd.f32 %v768_v63, %v3004_v45  ;;  %v1008_v34 = vunpack.c.l.b16 %v845_v43  ;;  %v1009_v14 = vunpack.c.h.b16 %v845_v43  ;;  %v713_v1 = vadd.f32 %v712_v24, %v2993_v10  ;;  %v741_v60 = vpop.f32.mrf.mxu1 }
 0x12f   :  { %v893_v10 = vadd.f32 %v892_v6, %v817_v21 }
 0x130   :  { %v798_v20 = vadd.f32 %v797_v53, %v769_v3  ;;  %v1028_v59 = vpack.c.b16 %v1008_v34, %v1004_v0  ;;  %v1029_v62 = vpack.c.b16 %v1009_v14, %v1005_v38  ;;  %v742_v5 = vadd.f32 %v741_v60, %v713_v1 }
 0x131   :  { %v894_v39 = vadd.f32 %v893_v10, %v821_v49 }
 0x132   :  { %v829_v4 = vmax.f32 %v798_v20, 0.0  ;;  %1446 = vmatmul.bf16.gmra.mxu2 %v1028_v59  ;;  %1475 = vmatmul.bf16.gmra.mxu3 %v1029_v62  ;;  %v832_v11 = vmax.f32 %v742_v5, 0.0 }
 0x133   :  { %1504 = vmatmul.bf16.gmra.mxu0 %v2984_v27  ;;  %1533 = vmatmul.bf16.gmra.mxu1 %v2986_v28  ;;  %v895_v8 = vadd.f32 %v894_v39, %v825_v37 }
 0x134   :  { %v847_v16 = vpack.c.bf16 %v829_v4, %v828_v2  ;;  %v890_v47 = vadd.f32 %v889_v55, %v832_v11 }
 0x135   :  { %v770_v13 = vpop.f32.mrf.mxu2  ;;  %v896_v32 = vadd.f32 %v895_v8, %v829_v4 }
 0x136   :  { %863 = vst [vmem:[#allocation12 + $0x68] sm:$0xff] %v847_v16  ;;  %v771_v22 = vadd.f32 %v770_v13, %v3004_v45  ;;  %v799_v40 = vpop.f32.mrf.mxu3  ;;  %v1012_v33 = vunpack.c.l.b16 %v847_v16  ;;  %v1013_v21 = vunpack.c.h.b16 %v847_v16 }
 0x137   :  { %904 = vst [vmem:[#allocation15 + $0x10] sm:$0xff] %v890_v47 }
 0x138   :  { %v800_v9 = vadd.f32 %v799_v40, %v771_v22 }
 0x13a   :  { %v833_v27 = vmax.f32 %v800_v9, 0.0  ;;  %v1732_v9 = vld [vmem:[#allocation3 + $0x10] sm:$0xff] }
 0x13c   :  { %v849_v18 = vpack.c.bf16 %v833_v27, %v832_v11  ;;  %v897_v28 = vadd.f32 %v896_v32, %v833_v27 }
 0x13e   :  { %865 = vst [vmem:[#allocation12 + $0x78] sm:$0xff] %v849_v18  ;;  %v1016_v15 = vunpack.c.l.b16 %v849_v18  ;;  %v1017_v23 = vunpack.c.h.b16 %v849_v18 }
 0x13f   :  { %905 = vst [vmem:[#allocation15 + $0x18] sm:$0xff] %v897_v28  ;;  %1819 = dma.vmem_to_hbm [thread:$0]  %s1812_s9, 2048, %s1814_s29, [#allocation13], %s2762_s13, %s2762_s13, %s2763_s14   ;;  %v1730_v28 = vld [vmem:[#allocation3] sm:$0xff] }
 0x140   :  { %v1032_v7 = vpack.c.b16 %v1016_v15, %v1012_v33  ;;  %v1033_v51 = vpack.c.b16 %v1017_v23, %v1013_v21  ;;  %v1734_v33 = vld [vmem:[#allocation3 + $0x20] sm:$0xff]  ;;  %v1736_v23 = vld [vmem:[#allocation3 + $0x30] sm:$0xff] }
 0x142   :  { %1451 = vmatmul.bf16.gmra.mxu2 %v1032_v7  ;;  %1480 = vmatmul.bf16.gmra.mxu3 %v1033_v51 }
 0x143   :  { %1509 = vmatmul.bf16.gmra.mxu0 %v3012_v17  ;;  %1538 = vmatmul.bf16.gmra.mxu1 %v3014_v19 }
 0x14f   :  { %v1379_v45 = vpop.f32.mrf.mxu0  ;;  %v1408_v49 = vpop.f32.mrf.mxu1 }
 0x152   :  { %1552 = vmatmul.bf16.vlgmr.msrb.gmra.mxu2 %v3041_v42  ;;  %1581 = vmatmul.bf16.vlgmr.msrb.gmra.mxu3 %v3043_v61  ;;  %v3120_v42 = vld [vmem:[%s3166_s4] sm:$0x3]  ;;  %v1409_v61 = vadd.f32 %v1408_v49, %v1379_v45  ;;  %s2770_s4 = smov [#allocation15]  }
 0x153   :  { %v3126_v30 = vperm.slane %v3120_v42, 0  ;;  %s1836_s6 = sshll.u32 %s2770_s4, 4  ;;  %s1837_s6 = int_to_ptr.vmem [resolvable:$true] %s1836_s6 }
 0x154   :  { %1841 = dma.vmem_to_hbm [thread:$0]  %s1837_s6, 512, %s1839_s12, [#allocation16]  }
 0x157   :  { %v1381_v50 = vpop.f32.mrf.mxu0  ;;  %v1410_v48 = vpop.f32.mrf.mxu1 }
 0x158   :  { %v1411_v37 = vadd.f32 %v1410_v48, %v1381_v50  ;;  %v1738_v48 = vld [vmem:[#allocation3 + $0x40] sm:$0xff] }
 0x15f   :  { %v1384_v25 = vpop.f32.mrf.mxu0  ;;  %v1413_v17 = vpop.f32.mrf.mxu1 }
 0x160   :  { %v1414_v53 = vadd.f32 %v1413_v17, %v1384_v25 }
 0x162   :  { %1557 = vmatmul.bf16.gmra.mxu2 %v3073_v52  ;;  %1586 = vmatmul.bf16.gmra.mxu3 %v3075_v46 }
 0x167   :  { %v1386_v26 = vpop.f32.mrf.mxu0  ;;  %v1415_v19 = vpop.f32.mrf.mxu1 }
 0x168   :  { %v1416_v2 = vadd.f32 %v1415_v19, %v1386_v26  ;;  %v1740_v19 = vld [vmem:[#allocation3 + $0x50] sm:$0xff] }
 0x16f   :  { %v1389_v36 = vpop.f32.mrf.mxu0  ;;  %v1418_v57 = vpop.f32.mrf.mxu1 }
 0x170   :  { %v1419_v5 = vadd.f32 %v1418_v57, %v1389_v36 }
 0x172   :  { %1562 = vmatmul.bf16.gmra.mxu2 %v1028_v59  ;;  %1591 = vmatmul.bf16.gmra.mxu3 %v1029_v62 }
 0x177   :  { %v1391_v0 = vpop.f32.mrf.mxu0  ;;  %v1420_v3 = vpop.f32.mrf.mxu1 }
 0x178   :  { %v1421_v13 = vadd.f32 %v1420_v3, %v1391_v0 }
 0x17f   :  { %v1394_v20 = vpop.f32.mrf.mxu0  ;;  %v1423_v60 = vpop.f32.mrf.mxu1 }
 0x180   :  { %v1424_v15 = vadd.f32 %v1423_v60, %v1394_v20 }
 0x182   :  { %1567 = vmatmul.bf16.gmra.mxu2 %v1032_v7  ;;  %1596 = vmatmul.bf16.gmra.mxu3 %v1033_v51 }
 0x187   :  { %v1396_v11 = vpop.f32.mrf.mxu0  ;;  %v1425_v10 = vpop.f32.mrf.mxu1 }
 0x188   :  { %v1426_v36 = vadd.f32 %v1425_v10, %v1396_v11 }
 0x190   :  { %v1495_v32 = vpop.f32.mrf.mxu0  ;;  %v1524_v27 = vpop.f32.mrf.mxu1 }
 0x195   :  { %v1437_v52 = vpop.f32.mrf.mxu2  ;;  %v1466_v46 = vpop.f32.mrf.mxu3 }
 0x196   :  { %v1438_v29 = vadd.f32 %v1437_v52, %v1409_v61 }
 0x198   :  { %v1467_v35 = vadd.f32 %v1466_v46, %v1438_v29  ;;  %v1497_v57 = vpop.f32.mrf.mxu0 }
 0x19a   :  { %v1698_v58 = vadd.f32 %v3126_v30, %v1467_v35  ;;  %v1742_v35 = vld [vmem:[#allocation3 + $0x60] sm:$0xff] }
 0x19c   :  { %1714 = vst [vmem:[#allocation11] sm:$0xff] %v1698_v58  ;;  %v1746_v45 = vsub.f32 %v1698_v58, %v1730_v28 }
 0x19d   :  { %v1439_v41 = vpop.f32.mrf.mxu2  ;;  %v1468_v31 = vpop.f32.mrf.mxu3 }
 0x19e   :  { %v1440_v43 = vadd.f32 %v1439_v41, %v1411_v37  ;;  %v1762_v61 = vmul.f32 %v1746_v45, %v1746_v45  ;;  %v1526_v37 = vpop.f32.mrf.mxu1 }
 0x1a0   :  { %v1469_v44 = vadd.f32 %v1468_v31, %v1440_v43 }
 0x1a2   :  { %v1700_v63 = vadd.f32 %v3126_v30, %v1469_v44 }
 0x1a4   :  { %1716 = vst [vmem:[#allocation11 + $0x10] sm:$0xff] %v1700_v63  ;;  %v1748_v21 = vsub.f32 %v1700_v63, %v1732_v9 }
 0x1a5   :  { %v1442_v24 = vpop.f32.mrf.mxu2  ;;  %v1471_v34 = vpop.f32.mrf.mxu3 }
 0x1a6   :  { %v1443_v38 = vadd.f32 %v1442_v24, %v1414_v53  ;;  %v1764_v25 = vmul.f32 %v1748_v21, %v1748_v21 }
 0x1a8   :  { %v1472_v14 = vadd.f32 %v1471_v34, %v1443_v38  ;;  %v1778_v41 = vadd.f32 %v1764_v25, %v1762_v61 }
 0x1aa   :  { %v1702_v54 = vadd.f32 %v3126_v30, %v1472_v14  ;;  %v1744_v14 = vld [vmem:[#allocation3 + $0x70] sm:$0xff] }
 0x1ac   :  { %1718 = vst [vmem:[#allocation11 + $0x20] sm:$0xff] %v1702_v54  ;;  %v1750_v49 = vsub.f32 %v1702_v54, %v1734_v33 }
 0x1ad   :  { %v1444_v1 = vpop.f32.mrf.mxu2  ;;  %v1473_v56 = vpop.f32.mrf.mxu3 }
 0x1ae   :  { %v1445_v59 = vadd.f32 %v1444_v1, %v1416_v2  ;;  %v1766_v52 = vmul.f32 %v1750_v49, %v1750_v49 }
 0x1b0   :  { %v1474_v62 = vadd.f32 %v1473_v56, %v1445_v59  ;;  %v1779_v63 = vadd.f32 %v1778_v41, %v1766_v52  ;;  %v1525_v56 = vadd.f32 %v1524_v27, %v1495_v32 }
 0x1b2   :  { %v1704_v12 = vadd.f32 %v3126_v30, %v1474_v62 }
 0x1b4   :  { %1720 = vst [vmem:[#allocation11 + $0x30] sm:$0xff] %v1704_v12  ;;  %v1752_v17 = vsub.f32 %v1704_v12, %v1736_v23  ;;  %v1500_v12 = vpop.f32.mrf.mxu0 }
 0x1b5   :  { %v1447_v6 = vpop.f32.mrf.mxu2  ;;  %v1476_v4 = vpop.f32.mrf.mxu3 }
 0x1b6   :  { %v1448_v55 = vadd.f32 %v1447_v6, %v1419_v5  ;;  %v1768_v31 = vmul.f32 %v1752_v17, %v1752_v17  ;;  %v1529_v5 = vpop.f32.mrf.mxu1 }
 0x1b7   :  { %v1530_v27 = vadd.f32 %v1529_v5, %v1500_v12  ;;  %v1741_v12 = vld [vmem:[#allocation3 + $0x58] sm:$0xff] }
 0x1b8   :  { %v1477_v16 = vadd.f32 %v1476_v4, %v1448_v55  ;;  %v1780_v24 = vadd.f32 %v1779_v63, %v1768_v31  ;;  %v3143_v4 = vperm.slane %v3120_v42, 1  ;;  %v1731_v63 = vld [vmem:[#allocation3 + $0x8] sm:$0xff] }
 0x1ba   :  { %v1706_v47 = vadd.f32 %v3126_v30, %v1477_v16 }
 0x1bc   :  { %1722 = vst [vmem:[#allocation11 + $0x40] sm:$0xff] %v1706_v47  ;;  %v1754_v46 = vsub.f32 %v1706_v47, %v1738_v48 }
 0x1bd   :  { %v1449_v39 = vpop.f32.mrf.mxu2  ;;  %v1478_v22 = vpop.f32.mrf.mxu3 }
 0x1be   :  { %v1450_v40 = vadd.f32 %v1449_v39, %v1421_v13  ;;  %v1770_v53 = vmul.f32 %v1754_v46, %v1754_v46 }
 0x1c0   :  { %v1479_v8 = vadd.f32 %v1478_v22, %v1450_v40  ;;  %v1781_v54 = vadd.f32 %v1780_v24, %v1770_v53  ;;  %v1502_v40 = vpop.f32.mrf.mxu0  ;;  %v1735_v53 = vld [vmem:[#allocation3 + $0x28] sm:$0xff]  ;;  %v1737_v24 = vld [vmem:[#allocation3 + $0x38] sm:$0xff] }
 0x1c2   :  { %v1708_v18 = vadd.f32 %v3126_v30, %v1479_v8  ;;  %v1531_v8 = vpop.f32.mrf.mxu1 }
 0x1c4   :  { %1724 = vst [vmem:[#allocation11 + $0x50] sm:$0xff] %v1708_v18  ;;  %v1756_v43 = vsub.f32 %v1708_v18, %v1740_v19 }
 0x1c5   :  { %v1452_v7 = vpop.f32.mrf.mxu2  ;;  %v1481_v51 = vpop.f32.mrf.mxu3 }
 0x1c6   :  { %v1453_v50 = vadd.f32 %v1452_v7, %v1424_v15  ;;  %v1772_v34 = vmul.f32 %v1756_v43, %v1756_v43  ;;  %v1532_v7 = vadd.f32 %v1531_v8, %v1502_v40 }
 0x1c8   :  { %v1482_v26 = vadd.f32 %v1481_v51, %v1453_v50  ;;  %v1782_v60 = vadd.f32 %v1781_v54, %v1772_v34  ;;  %v1505_v15 = vpop.f32.mrf.mxu0 }
 0x1ca   :  { %v1710_v29 = vadd.f32 %v3126_v30, %v1482_v26  ;;  %v1534_v21 = vpop.f32.mrf.mxu1 }
 0x1cb   :  { %v1535_v25 = vadd.f32 %v1534_v21, %v1505_v15 }
 0x1cc   :  { %1726 = vst [vmem:[#allocation11 + $0x60] sm:$0xff] %v1710_v29  ;;  %v1758_v0 = vsub.f32 %v1710_v29, %v1742_v35 }
 0x1cd   :  { %v1454_v58 = vpop.f32.mrf.mxu2  ;;  %v1483_v44 = vpop.f32.mrf.mxu3 }
 0x1ce   :  { %v1455_v3 = vadd.f32 %v1454_v58, %v1426_v36  ;;  %v1774_v2 = vmul.f32 %v1758_v0, %v1758_v0  ;;  %v1733_v58 = vld [vmem:[#allocation3 + $0x18] sm:$0xff] }
 0x1d0   :  { %v1484_v38 = vadd.f32 %v1483_v44, %v1455_v3  ;;  %v1783_v11 = vadd.f32 %v1782_v60, %v1774_v2  ;;  %v1507_v17 = vpop.f32.mrf.mxu0 }
 0x1d2   :  { %v1712_v1 = vadd.f32 %v3126_v30, %v1484_v38  ;;  %v1527_v30 = vadd.f32 %v1526_v37, %v1497_v57  ;;  %v1536_v26 = vpop.f32.mrf.mxu1 }
 0x1d3   :  { %v1537_v35 = vadd.f32 %v1536_v26, %v1507_v17 }
 0x1d4   :  { %1728 = vst [vmem:[#allocation11 + $0x70] sm:$0xff] %v1712_v1  ;;  %v1760_v20 = vsub.f32 %v1712_v1, %v1744_v14  ;;  %v1739_v1 = vld [vmem:[#allocation3 + $0x48] sm:$0xff] }
 0x1d5   :  { %v1553_v59 = vpop.f32.mrf.mxu2  ;;  %v1582_v62 = vpop.f32.mrf.mxu3 }
 0x1d6   :  { %v1554_v6 = vadd.f32 %v1553_v59, %v1525_v56  ;;  %v1776_v55 = vmul.f32 %v1760_v20, %v1760_v20 }
 0x1d8   :  { %v1583_v10 = vadd.f32 %v1582_v62, %v1554_v6  ;;  %v1784_v16 = vadd.f32 %v1783_v11, %v1776_v55  ;;  %v1510_v41 = vpop.f32.mrf.mxu0 }
 0x1da   :  { %v1699_v47 = vadd.f32 %v3143_v4, %v1583_v10  ;;  %1792 = vst [vmem:[#allocation14] sm:$0xff] %v1784_v16  ;;  %v1539_v31 = vpop.f32.mrf.mxu1  ;;  %v1743_v10 = vld [vmem:[#allocation3 + $0x68] sm:$0xff] }
 0x1db   :  { %v1540_v0 = vadd.f32 %v1539_v31, %v1510_v41 }
 0x1dc   :  { %1715 = vst [vmem:[#allocation11 + $0x8] sm:$0xff] %v1699_v47  ;;  %v1747_v14 = vsub.f32 %v1699_v47, %v1731_v63 }
 0x1dd   :  { %v1555_v13 = vpop.f32.mrf.mxu2  ;;  %v1584_v39 = vpop.f32.mrf.mxu3 }
 0x1de   :  { %v1556_v22 = vadd.f32 %v1555_v13, %v1527_v30  ;;  %v1763_v5 = vmul.f32 %v1747_v14, %v1747_v14 }
 0x1e0   :  { %v1585_v9 = vadd.f32 %v1584_v39, %v1556_v22  ;;  %v1512_v59 = vpop.f32.mrf.mxu0 }
 0x1e2   :  { %v1701_v32 = vadd.f32 %v3143_v4, %v1585_v9  ;;  %v1541_v62 = vpop.f32.mrf.mxu1 }
 0x1e3   :  { %v1542_v16 = vadd.f32 %v1541_v62, %v1512_v59 }
 0x1e4   :  { %1717 = vst [vmem:[#allocation11 + $0x18] sm:$0xff] %v1701_v32  ;;  %v1749_v3 = vsub.f32 %v1701_v32, %v1733_v58 }
 0x1e5   :  { %v1558_v42 = vpop.f32.mrf.mxu2  ;;  %v1587_v18 = vpop.f32.mrf.mxu3 }
 0x1e6   :  { %v1559_v28 = vadd.f32 %v1558_v42, %v1530_v27  ;;  %v1765_v56 = vmul.f32 %v1749_v3, %v1749_v3 }
 0x1e8   :  { %v1588_v33 = vadd.f32 %v1587_v18, %v1559_v28  ;;  %v1785_v30 = vadd.f32 %v1765_v56, %v1763_v5  ;;  %v1745_v28 = vld [vmem:[#allocation3 + $0x78] sm:$0xff] }
 0x1ea   :  { %v1703_v23 = vadd.f32 %v3143_v4, %v1588_v33 }
 0x1ec   :  { %1719 = vst [vmem:[#allocation11 + $0x28] sm:$0xff] %v1703_v23  ;;  %v1751_v54 = vsub.f32 %v1703_v23, %v1735_v53 }
 0x1ed   :  { %v1560_v51 = vpop.f32.mrf.mxu2  ;;  %v1589_v45 = vpop.f32.mrf.mxu3 }
 0x1ee   :  { %v1561_v49 = vadd.f32 %v1560_v51, %v1532_v7  ;;  %v1767_v6 = vmul.f32 %v1751_v54, %v1751_v54 }
 0x1f0   :  { %v1590_v50 = vadd.f32 %v1589_v45, %v1561_v49  ;;  %v1786_v22 = vadd.f32 %v1785_v30, %v1767_v6 }
 0x1f2   :  { %v1705_v48 = vadd.f32 %v3143_v4, %v1590_v50 }
 0x1f4   :  { %1721 = vst [vmem:[#allocation11 + $0x38] sm:$0xff] %v1705_v48  ;;  %v1753_v20 = vsub.f32 %v1705_v48, %v1737_v24 }
 0x1f5   :  { %v1563_v19 = vpop.f32.mrf.mxu2  ;;  %v1592_v61 = vpop.f32.mrf.mxu3 }
 0x1f6   :  { %v1564_v52 = vadd.f32 %v1563_v19, %v1535_v25  ;;  %v1769_v13 = vmul.f32 %v1753_v20, %v1753_v20 }
 0x1f8   :  { %v1593_v46 = vadd.f32 %v1592_v61, %v1564_v52  ;;  %v1787_v27 = vadd.f32 %v1786_v22, %v1769_v13 }
 0x1fa   :  { %v1707_v29 = vadd.f32 %v3143_v4, %v1593_v46 }
 0x1fc   :  { %1723 = vst [vmem:[#allocation11 + $0x48] sm:$0xff] %v1707_v29  ;;  %v1755_v55 = vsub.f32 %v1707_v29, %v1739_v1 }
 0x1fd   :  { %v1565_v36 = vpop.f32.mrf.mxu2  ;;  %v1594_v57 = vpop.f32.mrf.mxu3 }
 0x1fe   :  { %v1566_v37 = vadd.f32 %v1565_v36, %v1537_v35  ;;  %v1771_v40 = vmul.f32 %v1755_v55, %v1755_v55 }
 0x200   :  { %v1595_v43 = vadd.f32 %v1594_v57, %v1566_v37  ;;  %v1788_v33 = vadd.f32 %v1787_v27, %v1771_v40 }
 0x202   :  { %v1709_v44 = vadd.f32 %v3143_v4, %v1595_v43 }
 0x204   :  { %1725 = vst [vmem:[#allocation11 + $0x58] sm:$0xff] %v1709_v44  ;;  %v1757_v39 = vsub.f32 %v1709_v44, %v1741_v12 }
 0x205   :  { %v1568_v34 = vpop.f32.mrf.mxu2  ;;  %v1597_v38 = vpop.f32.mrf.mxu3 }
 0x206   :  { %v1569_v2 = vadd.f32 %v1568_v34, %v1540_v0  ;;  %v1773_v42 = vmul.f32 %v1757_v39, %v1757_v39 }
 0x208   :  { %v1598_v60 = vadd.f32 %v1597_v38, %v1569_v2  ;;  %v1789_v7 = vadd.f32 %v1788_v33, %v1773_v42 }
 0x20a   :  { %v1711_v11 = vadd.f32 %v3143_v4, %v1598_v60 }
 0x20c   :  { %1727 = vst [vmem:[#allocation11 + $0x68] sm:$0xff] %v1711_v11  ;;  %v1759_v8 = vsub.f32 %v1711_v11, %v1743_v10 }
 0x20d   :  { %v1570_v47 = vpop.f32.mrf.mxu2  ;;  %v1599_v32 = vpop.f32.mrf.mxu3 }
 0x20e   :  { %v1571_v9 = vadd.f32 %v1570_v47, %v1542_v16  ;;  %v1775_v15 = vmul.f32 %v1759_v8, %v1759_v8 }
 0x210   :  { %v1600_v18 = vadd.f32 %v1599_v32, %v1571_v9  ;;  %v1790_v45 = vadd.f32 %v1789_v7, %v1775_v15 }
 0x212   :  { %v1713_v21 = vadd.f32 %v3143_v4, %v1600_v18 }
 0x214   :  { %1729 = vst [vmem:[#allocation11 + $0x78] sm:$0xff] %v1713_v21  ;;  %v1761_v23 = vsub.f32 %v1713_v21, %v1745_v28 }
 0x215   :  { %1806 = dma.vmem_to_hbm [thread:$0]  %s1799_s15, 2048, %s1801_s18, [#allocation5], %s2762_s13, %s2762_s13, %s2763_s14  }
 0x216   :  { %v1777_v51 = vmul.f32 %v1761_v23, %v1761_v23 }
 0x218   :  { %v1791_v49 = vadd.f32 %v1790_v45, %v1777_v51 }
 0x21a   :  { %1793 = vst [vmem:[#allocation14 + $0x8] sm:$0xff] %v1791_v49 }
 0x21b   :  { %1830 = dma.vmem_to_hbm [thread:$0]  %s1826_s0, 256, %s1828_s21, [#allocation13]  }
 0x21c   :  { %2755 = dma.done.wait [#allocation5], 2048  }
 0x21d   :  { %2756 = vsyncadd [#allocation5], 4294965248 }
 0x21e   :  { %2757 = dma.done.wait [#allocation13], 2304  }
 0x21f   :  { %2758 = vsyncadd [#allocation13], 4294964992 }
 0x220   :  { %2759 = dma.done.wait [#allocation16], 512  }
 0x221   :  { %2760 = vsyncadd [#allocation16], 4294966784 }
 0x222   :  { %1858 = vsyncpa [#allocation4], 1 }
 0x223   :  { %1859 = vsyncpa [#allocation7], 1 }
 0x224   :  { %1860 = vsyncpa [#allocation10], 1 }
 0x225   :  { %1861 = vsyncpa [#allocation5], 1 }
 0x226   :  { %1862 = vsyncpa [#allocation13], 1 }
 0x227   :  { %1863 = vsyncpa [#allocation16], 1 }

</bundles_post_ra>
